<compile_context>
chip_gen: v7x
topology: tpu7x:2x2x1
jax: 0.10.0
libtpu: 0.0.40
codegen_flags: <defaults>
</compile_context>

<pallas_src>
import jax
import jax.numpy as jnp
from jax.experimental import pallas as pl
from jax.experimental.pallas import tpu as pltpu

LANE = 128      # lane grain (last dim)
SUBLANE = 8     # sublane grain (second-to-last dim)
NEG_INF = -1e30


def _round_up(x, m):
    return ((x + m - 1) // m) * m


def _pad2(a, rows, cols, fill=0.0):
    r, c = a.shape
    return jnp.pad(a, ((0, rows - r), (0, cols - c)), constant_values=fill)


# -----------------------------------------------------------------------------
# Kernel
# -----------------------------------------------------------------------------
def luong_decoder_kernel(
    # inputs
    x_ref,       # (Bp, Hp)     bf16  embedded input token
    h_ref,       # (Bp, Hp)     f32   previous hidden state (layer 0)
    enc_ref,     # (Bp, L, Hp)  f32   encoder outputs, batch-major
    wir_ref, wiz_ref, win_ref,          # (Hp, Hp) bf16  input->hidden gate weights (transposed)
    whr_ref, whz_ref, whn_ref,          # (Hp, Hp) bf16  hidden->hidden gate weights (transposed)
    br_ref, bz_ref, bin_ref, bhn_ref,   # (1, Hp)  f32   gate biases
    wc1_ref, wc2_ref,                   # (Hp, Hp) bf16  concat-linear halves (transposed)
    bc_ref,                             # (1, Hp)  f32
    wo_ref,                             # (Hp, TV) bf16  vocab-projection tile (transposed)
    bo_ref,                             # (1, TV)  f32   vocab bias tile (-1e30 in padding)
    # outputs
    out_ref,     # (nV, Bp, TV) f32  softmax probs, tile-major; resident across the grid
    hnew_ref,    # (Bp, Hp)     f32  new hidden state
    # scratch
    concat_ref,  # (Bp, Hp)     bf16 concat-linear output; persists across V tiles
):
    j = pl.program_id(0)

    # ---- GRU step + dot attention + concat linear: once, on the first V tile ----
    @pl.when(j == 0)
    def _():
        x = x_ref[...]                                    # bf16 (Bp, Hp)
        h = h_ref[...]                                    # f32  (Bp, Hp)
        hb = h.astype(jnp.bfloat16)

        # GRU (PyTorch gate order r, z, n); bf16 MXU matmuls, f32 accumulation.
        i_r = jnp.dot(x, wir_ref[...], preferred_element_type=jnp.float32)
        i_z = jnp.dot(x, wiz_ref[...], preferred_element_type=jnp.float32)
        i_n = jnp.dot(x, win_ref[...], preferred_element_type=jnp.float32)
        h_r = jnp.dot(hb, whr_ref[...], preferred_element_type=jnp.float32)
        h_z = jnp.dot(hb, whz_ref[...], preferred_element_type=jnp.float32)
        h_n = jnp.dot(hb, whn_ref[...], preferred_element_type=jnp.float32)

        r = jax.nn.sigmoid(i_r + h_r + br_ref[...])
        z = jax.nn.sigmoid(i_z + h_z + bz_ref[...])
        n = jnp.tanh(i_n + bin_ref[...] + r * (h_n + bhn_ref[...]))
        h_new = (1.0 - z) * n + z * h                     # (Bp, Hp) == rnn_output
        hnew_ref[...] = h_new

        # Dot attention on the MXU: energies[b, l] = <h_new[b, :], enc[b, l, :]>
        enc = enc_ref[...]                                # (Bp, L, Hp) f32
        hq = h_new[:, None, :]                            # (Bp, 1, Hp)
        s = jnp.einsum('bqh,blh->bql', hq, enc,
                       preferred_element_type=jnp.float32)        # (Bp, 1, L)
        m = jnp.max(s, axis=-1, keepdims=True)
        p = jnp.exp(s - m)
        denom = jnp.sum(p, axis=-1, keepdims=True)
        attn = p * pl.reciprocal(denom, approx=True)              # (Bp, 1, L)

        # context[b, :] = sum_l attn[b, l] * enc[b, l, :]   (MXU again)
        ctx3 = jnp.einsum('bql,blh->bqh', attn, enc,
                          preferred_element_type=jnp.float32)     # (Bp, 1, Hp)
        context = jnp.sum(ctx3, axis=1)                           # (Bp, Hp)

        # Concat linear, split into its two (H,H) halves (no in-kernel concat), + tanh.
        concat_out = jnp.tanh(
            jnp.dot(h_new.astype(jnp.bfloat16), wc1_ref[...],
                    preferred_element_type=jnp.float32)
            + jnp.dot(context.astype(jnp.bfloat16), wc2_ref[...],
                      preferred_element_type=jnp.float32)
            + bc_ref[...])
        concat_ref[...] = concat_out.astype(jnp.bfloat16)

    # ---- vocab projection for this V tile (weight streamed tile-by-tile) ----
    logits = jnp.dot(concat_ref[...], wo_ref[...],
                     preferred_element_type=jnp.float32) + bo_ref[...]    # (Bp, TV)
    out_ref[j] = logits

    # ---- exact softmax over the full (resident) logits on the last tile ----
    @pl.when(j == pl.num_programs(0) - 1)
    def _():
        lg = out_ref[...]                                                 # (nV, Bp, TV)
        m2 = jnp.max(jnp.max(lg, axis=2, keepdims=True), axis=0, keepdims=True)
        e2 = jnp.exp(lg - m2)
        d2 = jnp.sum(jnp.sum(e2, axis=2, keepdims=True), axis=0, keepdims=True)
        out_ref[...] = e2 * pl.reciprocal(d2, approx=True)


# -----------------------------------------------------------------------------
# Wrapper: one-time (decode-loop-invariant) prep + per-step call
# -----------------------------------------------------------------------------
def prepare_params(params, *, tv=LANE):
    """bf16 cast, per-gate split, transpose and padding to the (8,128) grain.
    Hoisted out of the decode loop."""
    H = params["w_ih"].shape[1]
    V = params["w_out"].shape[0]
    Hp = _round_up(H, LANE)
    Vp = _round_up(V, tv)
    wdt = jnp.bfloat16

    w_ih = params["w_ih"].astype(jnp.float32)
    w_hh = params["w_hh"].astype(jnp.float32)
    b_ih = params["b_ih"].astype(jnp.float32)
    b_hh = params["b_hh"].astype(jnp.float32)

    def gate_w(w, k):
        return _pad2(w[k * H:(k + 1) * H].T, Hp, Hp).astype(wdt)

    def pad_bias(b):
        return _pad2(b.reshape(1, H).astype(jnp.float32), 1, Hp)

    emb = params["embedding"].astype(jnp.float32)
    return {
        "H": H, "V": V, "Hp": Hp, "Vp": Vp, "tv": tv,
        # embedding table: bf16, feature dim pre-padded to Hp
        "emb": _pad2(emb, emb.shape[0], Hp).astype(wdt),
        # GRU weights, pre-split per gate (r, z, n) and transposed
        "w_ir": gate_w(w_ih, 0), "w_iz": gate_w(w_ih, 1), "w_in": gate_w(w_ih, 2),
        "w_hr": gate_w(w_hh, 0), "w_hz": gate_w(w_hh, 1), "w_hn": gate_w(w_hh, 2),
        # b_ir+b_hr / b_iz+b_hz can be folded; b_in / b_hn must stay separate (reset gate)
        "b_r": pad_bias(b_ih[:H] + b_hh[:H]),
        "b_z": pad_bias(b_ih[H:2 * H] + b_hh[H:2 * H]),
        "b_in": pad_bias(b_ih[2 * H:]),
        "b_hn": pad_bias(b_hh[2 * H:]),
        # concat linear split in two halves
        "w_c1": _pad2(params["w_concat"][:, :H].T.astype(jnp.float32), Hp, Hp).astype(wdt),
        "w_c2": _pad2(params["w_concat"][:, H:].T.astype(jnp.float32), Hp, Hp).astype(wdt),
        "b_c": pad_bias(params["b_concat"]),
        # vocab projection; padded bias columns get -1e30 so they vanish in the softmax
        "w_o": _pad2(params["w_out"].T.astype(jnp.float32), Hp, Vp).astype(wdt),
        "b_o": _pad2(params["b_out"].astype(jnp.float32).reshape(1, V), 1, Vp, fill=NEG_INF),
    }


def prepare_encoder_outputs(encoder_outputs, prep):
    """(L, B, H) -> padded batch-major (Bp, L, Hp).  Hoisted out of the decode loop."""
    L, B, H = encoder_outputs.shape
    Bp = _round_up(max(B, 1), SUBLANE)
    enc = jnp.transpose(encoder_outputs, (1, 0, 2)).astype(jnp.float32)
    return jnp.pad(enc, ((0, Bp - B), (0, 0), (0, prep["Hp"] - H)))


def luong_attn_decoder_step(prep, input_step, last_hidden, enc_prepared):
    """One decode step: returns (softmax output (B, V), hidden (1, B, H))."""
    B = input_step.shape[1]
    H, V, Hp, Vp, tv = prep["H"], prep["V"], prep["Hp"], prep["Vp"], prep["tv"]
    Bp, L = enc_prepared.shape[0], enc_prepared.shape[1]
    n_tiles = Vp // tv

    # TODO(synk): embedding gather (nn.Embedding) stays in plain JAX — a single-token
    # dynamic row gather has no clean BlockSpec form; embedding_dropout is identity.
    x = prep["emb"][input_step[0]]                          # (B, Hp) bf16
    x = jnp.pad(x, ((0, Bp - B), (0, 0)))                   # (Bp, Hp)
    h = last_hidden[0].astype(jnp.float32)                  # (B, H)
    h = jnp.pad(h, ((0, Bp - B), (0, Hp - H)))              # (Bp, Hp)

    def full_spec(shape):
        if len(shape) == 2:
            return pl.BlockSpec(shape, lambda j: (0, 0))
        return pl.BlockSpec(shape, lambda j: (0, 0, 0))

    in_specs = [
        full_spec((Bp, Hp)),                                  # x
        full_spec((Bp, Hp)),                                  # h
        full_spec((Bp, L, Hp)),                               # enc
        full_spec((Hp, Hp)), full_spec((Hp, Hp)), full_spec((Hp, Hp)),   # w_ir/iz/in
        full_spec((Hp, Hp)), full_spec((Hp, Hp)), full_spec((Hp, Hp)),   # w_hr/hz/hn
        full_spec((1, Hp)), full_spec((1, Hp)),                          # b_r, b_z
        full_spec((1, Hp)), full_spec((1, Hp)),                          # b_in, b_hn
        full_spec((Hp, Hp)), full_spec((Hp, Hp)),                        # w_c1, w_c2
        full_spec((1, Hp)),                                              # b_c
        pl.BlockSpec((Hp, tv), lambda j: (0, j)),                        # w_o tile (streamed)
        pl.BlockSpec((1, tv), lambda j: (0, j)),                         # b_o tile
    ]
    out_specs = (
        pl.BlockSpec((n_tiles, Bp, tv), lambda j: (0, 0, 0)),  # resident probs (tile-major)
        pl.BlockSpec((Bp, Hp), lambda j: (0, 0)),              # new hidden
    )

    probs3, h_new_p = pl.pallas_call(
        luong_decoder_kernel,
        out_shape=(
            jax.ShapeDtypeStruct((n_tiles, Bp, tv), jnp.float32),
            jax.ShapeDtypeStruct((Bp, Hp), jnp.float32),
        ),
        grid_spec=pltpu.PrefetchScalarGridSpec(
            num_scalar_prefetch=0,
            grid=(n_tiles,),
            in_specs=in_specs,
            out_specs=out_specs,
            scratch_shapes=[pltpu.VMEM((Bp, Hp), jnp.bfloat16)],
        ),
        # Previous hidden (input 1) aliased to the new-hidden output (output 1):
        # no extra HBM buffer churn inside an autoregressive decode loop.
        input_output_aliases={1: 1},
        compiler_params=pltpu.CompilerParams(
            # sequential: the resident-output softmax depends on all previous V tiles
            dimension_semantics=("arbitrary",),
            vmem_limit_bytes=32 * 1024 * 1024,
        ),
    )(
        x, h, enc_prepared,
        prep["w_ir"], prep["w_iz"], prep["w_in"],
        prep["w_hr"], prep["w_hz"], prep["w_hn"],
        prep["b_r"], prep["b_z"], prep["b_in"], prep["b_hn"],
        prep["w_c1"], prep["w_c2"], prep["b_c"],
        prep["w_o"], prep["b_o"],
    )

    # (nV, Bp, TV) tile-major probs -> (Bp, Vp); padded vocab columns are exactly 0.
    out_p = jnp.transpose(probs3, (1, 0, 2)).reshape(Bp, Vp)
    return out_p[:B, :V], h_new_p[:B, :H][None, :, :]


# -----------------------------------------------------------------------------
# Reference / test harness
# -----------------------------------------------------------------------------
def _init_params(key, voc_size, hidden_size):
    ks = jax.random.split(key, 9)
    s = 0.1
    H, V = hidden_size, voc_size
    return {
        "embedding": jax.random.normal(ks[0], (V, H), jnp.float32) * s,
        "w_ih": jax.random.normal(ks[1], (3 * H, H), jnp.float32) * s,
        "w_hh": jax.random.normal(ks[2], (3 * H, H), jnp.float32) * s,
        "b_ih": jax.random.normal(ks[3], (3 * H,), jnp.float32) * s,
        "b_hh": jax.random.normal(ks[4], (3 * H,), jnp.float32) * s,
        "w_concat": jax.random.normal(ks[5], (H, 2 * H), jnp.float32) * s,
        "b_concat": jax.random.normal(ks[6], (H,), jnp.float32) * s,
        "w_out": jax.random.normal(ks[7], (V, H), jnp.float32) * s,
        "b_out": jax.random.normal(ks[8], (V,), jnp.float32) * s,
    }


def _quantized_reference_params(params):
    """bf16-rounded weights (what the kernel actually multiplies), f32 math."""
    q = lambda a: a.astype(jnp.bfloat16).astype(jnp.float32)
    return {
        "embedding": q(params["embedding"]),
        "w_ih": q(params["w_ih"]), "w_hh": q(params["w_hh"]),
        "b_ih": params["b_ih"].astype(jnp.float32),
        "b_hh": params["b_hh"].astype(jnp.float32),
        "w_concat": q(params["w_concat"]),
        "b_concat": params["b_concat"].astype(jnp.float32),
        "w_out": q(params["w_out"]),
        "b_out": params["b_out"].astype(jnp.float32),
    }


def _reference_forward(input_step, last_hidden, encoder_outputs, p):
    """Pure-JAX f32 reference mirroring the PyTorch module."""
    H = last_hidden.shape[-1]
    x = p["embedding"][input_step[0]]
    h = last_hidden[0]
    gi = x @ p["w_ih"].T + p["b_ih"]
    gh = h @ p["w_hh"].T + p["b_hh"]
    r = jax.nn.sigmoid(gi[:, :H] + gh[:, :H])
    z = jax.nn.sigmoid(gi[:, H:2 * H] + gh[:, H:2 * H])
    n = jnp.tanh(gi[:, 2 * H:] + r * gh[:, 2 * H:])
    h_new = (1 - z) * n + z * h
    energies = jnp.sum(h_new[None, :, :] * encoder_outputs, axis=2).T
    attn = jax.nn.softmax(energies, axis=1)
    context = jnp.einsum("bl,lbh->bh", attn, encoder_outputs)
    concat_in = jnp.concatenate([h_new, context], axis=1)
    concat_out = jnp.tanh(concat_in @ p["w_concat"].T + p["b_concat"])
    out = jax.nn.softmax(concat_out @ p["w_out"].T + p["b_out"], axis=1)
    return out, h_new[None]


if __name__ == "__main__":
    B, H, L, V = 4, 32, 8, 200   # batch, hidden_size, encoder seq len, vocab size

    key = jax.random.PRNGKey(0)
    kp, ki, kh, ke = jax.random.split(key, 4)
    params = _init_params(kp, V, H)

    input_step = jax.random.randint(ki, (1, B), 0, V, dtype=jnp.int32)       # (1, B)
    last_hidden = jax.random.normal(kh, (1, B, H), jnp.float32)              # (1, B, H)
    encoder_outputs = jax.random.normal(ke, (L, B, H), jnp.float32)          # (L, B, H)

    # One-time prep (hoisted out of the decode loop): weight cast/split/pad and
    # encoder transpose/pad.
    prep = prepare_params(params)
    enc_prepared = prepare_encoder_outputs(encoder_outputs, prep)

    out, hidden = luong_attn_decoder_step(prep, input_step, last_hidden, enc_prepared)
    out = jax.block_until_ready(out)
    hidden = jax.block_until_ready(hidden)

    ref_out, ref_hidden = _reference_forward(
        input_step, last_hidden, encoder_outputs, _quantized_reference_params(params))

    assert out.shape == (B, V) and hidden.shape == (1, B, H)
    # bf16 weights/activations for the matmuls + approx reciprocals => loosened tolerance.
    err_o = float(jnp.max(jnp.abs(out - ref_out)))
    err_h = float(jnp.max(jnp.abs(hidden - ref_hidden)))
    assert jnp.allclose(out, ref_out, atol=1e-2), err_o
    assert jnp.allclose(hidden, ref_hidden, atol=1e-2), err_h
    # softmax rows still sum to 1 despite vocab padding
    assert jnp.allclose(jnp.sum(out, axis=1), 1.0, atol=5e-3)

    print("KERNEL_OK")
</pallas_src>

<mosaic_0001>
module attributes {stable_mosaic.version = 11 : i64} {
  func.func @luong_decoder_kernel(%arg0: i32, %arg1: memref<8x128xbf16, #tpu.memory_space<vmem>>, %arg2: memref<8x128xf32, #tpu.memory_space<vmem>>, %arg3: memref<8x8x128xf32, #tpu.memory_space<vmem>>, %arg4: memref<128x128xbf16, #tpu.memory_space<vmem>>, %arg5: memref<128x128xbf16, #tpu.memory_space<vmem>>, %arg6: memref<128x128xbf16, #tpu.memory_space<vmem>>, %arg7: memref<128x128xbf16, #tpu.memory_space<vmem>>, %arg8: memref<128x128xbf16, #tpu.memory_space<vmem>>, %arg9: memref<128x128xbf16, #tpu.memory_space<vmem>>, %arg10: memref<1x128xf32, #tpu.memory_space<vmem>>, %arg11: memref<1x128xf32, #tpu.memory_space<vmem>>, %arg12: memref<1x128xf32, #tpu.memory_space<vmem>>, %arg13: memref<1x128xf32, #tpu.memory_space<vmem>>, %arg14: memref<128x128xbf16, #tpu.memory_space<vmem>>, %arg15: memref<128x128xbf16, #tpu.memory_space<vmem>>, %arg16: memref<1x128xf32, #tpu.memory_space<vmem>>, %arg17: memref<128x128xbf16, #tpu.memory_space<vmem>>, %arg18: memref<1x128xf32, #tpu.memory_space<vmem>>, %arg19: memref<2x8x128xf32, #tpu.memory_space<vmem>>, %arg20: memref<8x128xf32, #tpu.memory_space<vmem>>, %arg21: memref<8x128xbf16, #tpu.memory_space<vmem>>) attributes {dimension_semantics = [#tpu.dimension_semantics<arbitrary>], iteration_bounds = array<i64: 2>, scalar_prefetch = 0 : i64, scratch_operands = 1 : i64, tpu.core_type = #tpu.core_type<tc>, window_params = [{pipeline_mode = #tpu.pipeline_mode<synchronous>, transform_indices = @transform_0, window_bounds = array<i64: 8, 128>}, {pipeline_mode = #tpu.pipeline_mode<synchronous>, transform_indices = @transform_1, window_bounds = array<i64: 8, 128>}, {pipeline_mode = #tpu.pipeline_mode<synchronous>, transform_indices = @transform_2, window_bounds = array<i64: 8, 8, 128>}, {pipeline_mode = #tpu.pipeline_mode<synchronous>, transform_indices = @transform_3, window_bounds = array<i64: 128, 128>}, {pipeline_mode = #tpu.pipeline_mode<synchronous>, transform_indices = @transform_4, window_bounds = array<i64: 128, 128>}, {pipeline_mode = #tpu.pipeline_mode<synchronous>, transform_indices = @transform_5, window_bounds = array<i64: 128, 128>}, {pipeline_mode = #tpu.pipeline_mode<synchronous>, transform_indices = @transform_6, window_bounds = array<i64: 128, 128>}, {pipeline_mode = #tpu.pipeline_mode<synchronous>, transform_indices = @transform_7, window_bounds = array<i64: 128, 128>}, {pipeline_mode = #tpu.pipeline_mode<synchronous>, transform_indices = @transform_8, window_bounds = array<i64: 128, 128>}, {pipeline_mode = #tpu.pipeline_mode<synchronous>, transform_indices = @transform_9, window_bounds = array<i64: 1, 128>}, {pipeline_mode = #tpu.pipeline_mode<synchronous>, transform_indices = @transform_10, window_bounds = array<i64: 1, 128>}, {pipeline_mode = #tpu.pipeline_mode<synchronous>, transform_indices = @transform_11, window_bounds = array<i64: 1, 128>}, {pipeline_mode = #tpu.pipeline_mode<synchronous>, transform_indices = @transform_12, window_bounds = array<i64: 1, 128>}, {pipeline_mode = #tpu.pipeline_mode<synchronous>, transform_indices = @transform_13, window_bounds = array<i64: 128, 128>}, {pipeline_mode = #tpu.pipeline_mode<synchronous>, transform_indices = @transform_14, window_bounds = array<i64: 128, 128>}, {pipeline_mode = #tpu.pipeline_mode<synchronous>, transform_indices = @transform_15, window_bounds = array<i64: 1, 128>}, {transform_indices = @transform_16, window_bounds = array<i64: 128, 128>}, {transform_indices = @transform_17, window_bounds = array<i64: 1, 128>}, {pipeline_mode = #tpu.pipeline_mode<synchronous>, transform_indices = @transform_18, window_bounds = array<i64: 2, 8, 128>}, {pipeline_mode = #tpu.pipeline_mode<synchronous>, transform_indices = @transform_19, window_bounds = array<i64: 8, 128>}]} {
    %c0_i32 = arith.constant 0 : i32
    %0 = arith.cmpi eq, %arg0, %c0_i32 : i32
    %1 = arith.extui %0 : i1 to i32
    %c0_i32_0 = arith.constant 0 : i32
    %2 = arith.cmpi ne, %1, %c0_i32_0 : i32
    scf.if %2 {
      %c0_9 = arith.constant 0 : index
      %c0_10 = arith.constant 0 : index
      %16 = vector.load %arg1[%c0_9, %c0_10] : memref<8x128xbf16, #tpu.memory_space<vmem>>, vector<8x128xbf16>
      %c0_11 = arith.constant 0 : index
      %c0_12 = arith.constant 0 : index
      %17 = vector.load %arg2[%c0_11, %c0_12] : memref<8x128xf32, #tpu.memory_space<vmem>>, vector<8x128xf32>
      %18 = arith.truncf %17 : vector<8x128xf32> to vector<8x128xbf16>
      %c0_13 = arith.constant 0 : index
      %c0_14 = arith.constant 0 : index
      %19 = vector.load %arg4[%c0_13, %c0_14] : memref<128x128xbf16, #tpu.memory_space<vmem>>, vector<128x128xbf16>
      %cst_15 = arith.constant dense<0.000000e+00> : vector<8x128xf32>
      %20 = tpu.matmul %16, %19, %cst_15 {dimension_numbers = #tpu.dot_dimension_numbers<[1], [0], [0], [1], [0, 0, 1, 1], [], []>} : vector<8x128xbf16>, vector<128x128xbf16>, vector<8x128xf32> -> vector<8x128xf32>
      %c0_16 = arith.constant 0 : index
      %c0_17 = arith.constant 0 : index
      %21 = vector.load %arg5[%c0_16, %c0_17] : memref<128x128xbf16, #tpu.memory_space<vmem>>, vector<128x128xbf16>
      %cst_18 = arith.constant dense<0.000000e+00> : vector<8x128xf32>
      %22 = tpu.matmul %16, %21, %cst_18 {dimension_numbers = #tpu.dot_dimension_numbers<[1], [0], [0], [1], [0, 0, 1, 1], [], []>} : vector<8x128xbf16>, vector<128x128xbf16>, vector<8x128xf32> -> vector<8x128xf32>
      %c0_19 = arith.constant 0 : index
      %c0_20 = arith.constant 0 : index
      %23 = vector.load %arg6[%c0_19, %c0_20] : memref<128x128xbf16, #tpu.memory_space<vmem>>, vector<128x128xbf16>
      %cst_21 = arith.constant dense<0.000000e+00> : vector<8x128xf32>
      %24 = tpu.matmul %16, %23, %cst_21 {dimension_numbers = #tpu.dot_dimension_numbers<[1], [0], [0], [1], [0, 0, 1, 1], [], []>} : vector<8x128xbf16>, vector<128x128xbf16>, vector<8x128xf32> -> vector<8x128xf32>
      %c0_22 = arith.constant 0 : index
      %c0_23 = arith.constant 0 : index
      %25 = vector.load %arg7[%c0_22, %c0_23] : memref<128x128xbf16, #tpu.memory_space<vmem>>, vector<128x128xbf16>
      %cst_24 = arith.constant dense<0.000000e+00> : vector<8x128xf32>
      %26 = tpu.matmul %18, %25, %cst_24 {dimension_numbers = #tpu.dot_dimension_numbers<[1], [0], [0], [1], [0, 0, 1, 1], [], []>} : vector<8x128xbf16>, vector<128x128xbf16>, vector<8x128xf32> -> vector<8x128xf32>
      %c0_25 = arith.constant 0 : index
      %c0_26 = arith.constant 0 : index
      %27 = vector.load %arg8[%c0_25, %c0_26] : memref<128x128xbf16, #tpu.memory_space<vmem>>, vector<128x128xbf16>
      %cst_27 = arith.constant dense<0.000000e+00> : vector<8x128xf32>
      %28 = tpu.matmul %18, %27, %cst_27 {dimension_numbers = #tpu.dot_dimension_numbers<[1], [0], [0], [1], [0, 0, 1, 1], [], []>} : vector<8x128xbf16>, vector<128x128xbf16>, vector<8x128xf32> -> vector<8x128xf32>
      %c0_28 = arith.constant 0 : index
      %c0_29 = arith.constant 0 : index
      %29 = vector.load %arg9[%c0_28, %c0_29] : memref<128x128xbf16, #tpu.memory_space<vmem>>, vector<128x128xbf16>
      %cst_30 = arith.constant dense<0.000000e+00> : vector<8x128xf32>
      %30 = tpu.matmul %18, %29, %cst_30 {dimension_numbers = #tpu.dot_dimension_numbers<[1], [0], [0], [1], [0, 0, 1, 1], [], []>} : vector<8x128xbf16>, vector<128x128xbf16>, vector<8x128xf32> -> vector<8x128xf32>
      %31 = arith.addf %20, %26 : vector<8x128xf32>
      %c0_31 = arith.constant 0 : index
      %c0_32 = arith.constant 0 : index
      %32 = vector.load %arg10[%c0_31, %c0_32] : memref<1x128xf32, #tpu.memory_space<vmem>>, vector<1x128xf32>
      %33 = vector.broadcast %32 : vector<1x128xf32> to vector<8x128xf32>
      %34 = arith.addf %31, %33 : vector<8x128xf32>
      %35 = arith.negf %34 : vector<8x128xf32>
      %36 = math.exp %35 : vector<8x128xf32>
      %cst_33 = arith.constant 1.000000e+00 : f32
      %37 = vector.broadcast %cst_33 : f32 to vector<8x128xf32>
      %38 = arith.addf %37, %36 : vector<8x128xf32>
      %39 = arith.divf %37, %38 : vector<8x128xf32>
      %40 = arith.addf %22, %28 : vector<8x128xf32>
      %c0_34 = arith.constant 0 : index
      %c0_35 = arith.constant 0 : index
      %41 = vector.load %arg11[%c0_34, %c0_35] : memref<1x128xf32, #tpu.memory_space<vmem>>, vector<1x128xf32>
      %42 = vector.broadcast %41 : vector<1x128xf32> to vector<8x128xf32>
      %43 = arith.addf %40, %42 : vector<8x128xf32>
      %44 = arith.negf %43 : vector<8x128xf32>
      %45 = math.exp %44 : vector<8x128xf32>
      %cst_36 = arith.constant 1.000000e+00 : f32
      %46 = vector.broadcast %cst_36 : f32 to vector<8x128xf32>
      %47 = arith.addf %46, %45 : vector<8x128xf32>
      %48 = arith.divf %46, %47 : vector<8x128xf32>
      %c0_37 = arith.constant 0 : index
      %c0_38 = arith.constant 0 : index
      %49 = vector.load %arg12[%c0_37, %c0_38] : memref<1x128xf32, #tpu.memory_space<vmem>>, vector<1x128xf32>
      %50 = vector.broadcast %49 : vector<1x128xf32> to vector<8x128xf32>
      %51 = arith.addf %24, %50 : vector<8x128xf32>
      %c0_39 = arith.constant 0 : index
      %c0_40 = arith.constant 0 : index
      %52 = vector.load %arg13[%c0_39, %c0_40] : memref<1x128xf32, #tpu.memory_space<vmem>>, vector<1x128xf32>
      %53 = vector.broadcast %52 : vector<1x128xf32> to vector<8x128xf32>
      %54 = arith.addf %30, %53 : vector<8x128xf32>
      %55 = arith.mulf %39, %54 : vector<8x128xf32>
      %56 = arith.addf %51, %55 : vector<8x128xf32>
      %57 = math.tanh %56 : vector<8x128xf32>
      %cst_41 = arith.constant 1.000000e+00 : f32
      %58 = vector.broadcast %cst_41 : f32 to vector<8x128xf32>
      %59 = arith.subf %58, %48 : vector<8x128xf32>
      %60 = arith.mulf %59, %57 : vector<8x128xf32>
      %61 = arith.mulf %48, %17 : vector<8x128xf32>
      %62 = arith.addf %60, %61 : vector<8x128xf32>
      %c0_42 = arith.constant 0 : index
      %c0_43 = arith.constant 0 : index
      %63 = vector.load %arg20[%c0_42, %c0_43] : memref<8x128xf32, #tpu.memory_space<vmem>>, vector<8x128xf32>
      tpu.vector_store %arg20[%c0_42, %c0_43], %62 {strides = array<i32>} : memref<8x128xf32, #tpu.memory_space<vmem>>, vector<8x128xf32>,
      %c0_44 = arith.constant 0 : index
      %c0_45 = arith.constant 0 : index
      %c0_46 = arith.constant 0 : index
      %64 = vector.load %arg3[%c0_44, %c0_45, %c0_46] : memref<8x8x128xf32, #tpu.memory_space<vmem>>, vector<8x8x128xf32>
      %65 = vector.shape_cast %62 : vector<8x128xf32> to vector<8x1x128xf32>
      "tpu.trace_start"() <{level = 10 : i32, message = "bqh,blh->bql"}> : () -> ()
      %cst_47 = arith.constant dense<0.000000e+00> : vector<8x1x8xf32>
      %66 = tpu.matmul %65, %64, %cst_47 {dimension_numbers = #tpu.dot_dimension_numbers<[2], [2], [1], [1], [0, 0, 0, 1, 1, 1], [0], [0]>} : vector<8x1x128xf32>, vector<8x8x128xf32>, vector<8x1x8xf32> -> vector<8x1x8xf32>
      "tpu.trace_stop"() : () -> ()
      %cst_48 = arith.constant dense<0xFF800000> : vector<8x1xf32>
      %67 = vector.multi_reduction <maximumf>, %66, %cst_48 [2] : vector<8x1x8xf32> to vector<8x1xf32>
      %68 = vector.shape_cast %67 : vector<8x1xf32> to vector<8x1x1xf32>
      %69 = vector.broadcast %68 : vector<8x1x1xf32> to vector<8x1x8xf32>
      %70 = arith.subf %66, %69 : vector<8x1x8xf32>
      %71 = math.exp %70 : vector<8x1x8xf32>
      %cst_49 = arith.constant dense<0.000000e+00> : vector<8x1xf32>
      %72 = vector.multi_reduction <add>, %71, %cst_49 [2] : vector<8x1x8xf32> to vector<8x1xf32>
      %73 = vector.shape_cast %72 : vector<8x1xf32> to vector<8x1x1xf32>
      %74 = tpu.reciprocal %73 {approx = true} : vector<8x1x1xf32> -> vector<8x1x1xf32>
      %75 = vector.broadcast %74 : vector<8x1x1xf32> to vector<8x1x8xf32>
      %76 = arith.mulf %71, %75 : vector<8x1x8xf32>
      "tpu.trace_start"() <{level = 10 : i32, message = "bql,blh->bqh"}> : () -> ()
      %cst_50 = arith.constant dense<0.000000e+00> : vector<8x1x128xf32>
      %77 = tpu.matmul %76, %64, %cst_50 {dimension_numbers = #tpu.dot_dimension_numbers<[2], [1], [1], [2], [0, 0, 0, 1, 1, 2], [0], [0]>} : vector<8x1x8xf32>, vector<8x8x128xf32>, vector<8x1x128xf32> -> vector<8x1x128xf32>
      "tpu.trace_stop"() : () -> ()
      %cst_51 = arith.constant dense<0.000000e+00> : vector<8x128xf32>
      %78 = vector.multi_reduction <add>, %77, %cst_51 [1] : vector<8x1x128xf32> to vector<8x128xf32>
      %79 = arith.truncf %62 : vector<8x128xf32> to vector<8x128xbf16>
      %c0_52 = arith.constant 0 : index
      %c0_53 = arith.constant 0 : index
      %80 = vector.load %arg14[%c0_52, %c0_53] : memref<128x128xbf16, #tpu.memory_space<vmem>>, vector<128x128xbf16>
      %cst_54 = arith.constant dense<0.000000e+00> : vector<8x128xf32>
      %81 = tpu.matmul %79, %80, %cst_54 {dimension_numbers = #tpu.dot_dimension_numbers<[1], [0], [0], [1], [0, 0, 1, 1], [], []>} : vector<8x128xbf16>, vector<128x128xbf16>, vector<8x128xf32> -> vector<8x128xf32>
      %82 = arith.truncf %78 : vector<8x128xf32> to vector<8x128xbf16>
      %c0_55 = arith.constant 0 : index
      %c0_56 = arith.constant 0 : index
      %83 = vector.load %arg15[%c0_55, %c0_56] : memref<128x128xbf16, #tpu.memory_space<vmem>>, vector<128x128xbf16>
      %cst_57 = arith.constant dense<0.000000e+00> : vector<8x128xf32>
      %84 = tpu.matmul %82, %83, %cst_57 {dimension_numbers = #tpu.dot_dimension_numbers<[1], [0], [0], [1], [0, 0, 1, 1], [], []>} : vector<8x128xbf16>, vector<128x128xbf16>, vector<8x128xf32> -> vector<8x128xf32>
      %85 = arith.addf %81, %84 : vector<8x128xf32>
      %c0_58 = arith.constant 0 : index
      %c0_59 = arith.constant 0 : index
      %86 = vector.load %arg16[%c0_58, %c0_59] : memref<1x128xf32, #tpu.memory_space<vmem>>, vector<1x128xf32>
      %87 = vector.broadcast %86 : vector<1x128xf32> to vector<8x128xf32>
      %88 = arith.addf %85, %87 : vector<8x128xf32>
      %89 = math.tanh %88 : vector<8x128xf32>
      %90 = arith.truncf %89 : vector<8x128xf32> to vector<8x128xbf16>
      %c0_60 = arith.constant 0 : index
      %c0_61 = arith.constant 0 : index
      %91 = vector.load %arg21[%c0_60, %c0_61] : memref<8x128xbf16, #tpu.memory_space<vmem>>, vector<8x128xbf16>
      tpu.vector_store %arg21[%c0_60, %c0_61], %90 {strides = array<i32>} : memref<8x128xbf16, #tpu.memory_space<vmem>>, vector<8x128xbf16>,
    } else {
    }
    %c0 = arith.constant 0 : index
    %c0_1 = arith.constant 0 : index
    %3 = vector.load %arg21[%c0, %c0_1] : memref<8x128xbf16, #tpu.memory_space<vmem>>, vector<8x128xbf16>
    %c0_2 = arith.constant 0 : index
    %c0_3 = arith.constant 0 : index
    %4 = vector.load %arg17[%c0_2, %c0_3] : memref<128x128xbf16, #tpu.memory_space<vmem>>, vector<128x128xbf16>
    %cst = arith.constant dense<0.000000e+00> : vector<8x128xf32>
    %5 = tpu.matmul %3, %4, %cst {dimension_numbers = #tpu.dot_dimension_numbers<[1], [0], [0], [1], [0, 0, 1, 1], [], []>} : vector<8x128xbf16>, vector<128x128xbf16>, vector<8x128xf32> -> vector<8x128xf32>
    %c0_4 = arith.constant 0 : index
    %c0_5 = arith.constant 0 : index
    %6 = vector.load %arg18[%c0_4, %c0_5] : memref<1x128xf32, #tpu.memory_space<vmem>>, vector<1x128xf32>
    %7 = vector.broadcast %6 : vector<1x128xf32> to vector<8x128xf32>
    %8 = arith.addf %5, %7 : vector<8x128xf32>
    %9 = arith.index_cast %arg0 : i32 to index
    %c0_6 = arith.constant 0 : index
    %c0_7 = arith.constant 0 : index
    %10 = vector.load %arg19[%9, %c0_6, %c0_7] : memref<2x8x128xf32, #tpu.memory_space<vmem>>, vector<1x8x128xf32>
    %11 = vector.shape_cast %10 : vector<1x8x128xf32> to vector<8x128xf32>
    %12 = vector.shape_cast %8 : vector<8x128xf32> to vector<1x8x128xf32>
    tpu.vector_store %arg19[%9, %c0_6, %c0_7], %12 {strides = array<i32>} : memref<2x8x128xf32, #tpu.memory_space<vmem>>, vector<1x8x128xf32>,
    %c1_i32 = arith.constant 1 : i32
    %13 = arith.cmpi eq, %arg0, %c1_i32 : i32
    %14 = arith.extui %13 : i1 to i32
    %c0_i32_8 = arith.constant 0 : i32
    %15 = arith.cmpi ne, %14, %c0_i32_8 : i32
    scf.if %15 {
      %c0_9 = arith.constant 0 : index
      %c0_10 = arith.constant 0 : index
      %c0_11 = arith.constant 0 : index
      %16 = vector.load %arg19[%c0_9, %c0_10, %c0_11] : memref<2x8x128xf32, #tpu.memory_space<vmem>>, vector<2x8x128xf32>
      %cst_12 = arith.constant dense<0xFF800000> : vector<2x8xf32>
      %17 = vector.multi_reduction <maximumf>, %16, %cst_12 [2] : vector<2x8x128xf32> to vector<2x8xf32>
      %18 = vector.shape_cast %17 : vector<2x8xf32> to vector<2x8x1xf32>
      %cst_13 = arith.constant dense<0xFF800000> : vector<8x1xf32>
      %19 = vector.multi_reduction <maximumf>, %18, %cst_13 [0] : vector<2x8x1xf32> to vector<8x1xf32>
      %20 = vector.shape_cast %19 : vector<8x1xf32> to vector<1x8x1xf32>
      %21 = vector.broadcast %20 : vector<1x8x1xf32> to vector<2x8x128xf32>
      %22 = arith.subf %16, %21 : vector<2x8x128xf32>
      %23 = math.exp %22 : vector<2x8x128xf32>
      %cst_14 = arith.constant dense<0.000000e+00> : vector<2x8xf32>
      %24 = vector.multi_reduction <add>, %23, %cst_14 [2] : vector<2x8x128xf32> to vector<2x8xf32>
      %25 = vector.shape_cast %24 : vector<2x8xf32> to vector<2x8x1xf32>
      %cst_15 = arith.constant dense<0.000000e+00> : vector<8x1xf32>
      %26 = vector.multi_reduction <add>, %25, %cst_15 [0] : vector<2x8x1xf32> to vector<8x1xf32>
      %27 = vector.shape_cast %26 : vector<8x1xf32> to vector<1x8x1xf32>
      %28 = tpu.reciprocal %27 {approx = true} : vector<1x8x1xf32> -> vector<1x8x1xf32>
      %29 = vector.broadcast %28 : vector<1x8x1xf32> to vector<2x8x128xf32>
      %30 = arith.mulf %23, %29 : vector<2x8x128xf32>
      %c0_16 = arith.constant 0 : index
      %c0_17 = arith.constant 0 : index
      %c0_18 = arith.constant 0 : index
      %31 = vector.load %arg19[%c0_16, %c0_17, %c0_18] : memref<2x8x128xf32, #tpu.memory_space<vmem>>, vector<2x8x128xf32>
      tpu.vector_store %arg19[%c0_16, %c0_17, %c0_18], %30 {strides = array<i32>} : memref<2x8x128xf32, #tpu.memory_space<vmem>>, vector<2x8x128xf32>,
    } else {
    }
    return
  }
  func.func @transform_0(%arg0: i32) -> (i32, i32) {
    %c0_i32 = arith.constant 0 : i32
    %c0_i32_0 = arith.constant 0 : i32
    %c0_i32_1 = arith.constant 0 : i32
    return %c0_i32, %c0_i32_0 : i32, i32
  }
  func.func @transform_1(%arg0: i32) -> (i32, i32) {
    %c0_i32 = arith.constant 0 : i32
    %c0_i32_0 = arith.constant 0 : i32
    %c0_i32_1 = arith.constant 0 : i32
    return %c0_i32, %c0_i32_0 : i32, i32
  }
  func.func @transform_2(%arg0: i32) -> (i32, i32, i32) {
    %c0_i32 = arith.constant 0 : i32
    %c0_i32_0 = arith.constant 0 : i32
    %c0_i32_1 = arith.constant 0 : i32
    %c0_i32_2 = arith.constant 0 : i32
    return %c0_i32, %c0_i32_0, %c0_i32_1 : i32, i32, i32
  }
  func.func @transform_3(%arg0: i32) -> (i32, i32) {
    %c0_i32 = arith.constant 0 : i32
    %c0_i32_0 = arith.constant 0 : i32
    %c0_i32_1 = arith.constant 0 : i32
    return %c0_i32, %c0_i32_0 : i32, i32
  }
  func.func @transform_4(%arg0: i32) -> (i32, i32) {
    %c0_i32 = arith.constant 0 : i32
    %c0_i32_0 = arith.constant 0 : i32
    %c0_i32_1 = arith.constant 0 : i32
    return %c0_i32, %c0_i32_0 : i32, i32
  }
  func.func @transform_5(%arg0: i32) -> (i32, i32) {
    %c0_i32 = arith.constant 0 : i32
    %c0_i32_0 = arith.constant 0 : i32
    %c0_i32_1 = arith.constant 0 : i32
    return %c0_i32, %c0_i32_0 : i32, i32
  }
  func.func @transform_6(%arg0: i32) -> (i32, i32) {
    %c0_i32 = arith.constant 0 : i32
    %c0_i32_0 = arith.constant 0 : i32
    %c0_i32_1 = arith.constant 0 : i32
    return %c0_i32, %c0_i32_0 : i32, i32
  }
  func.func @transform_7(%arg0: i32) -> (i32, i32) {
    %c0_i32 = arith.constant 0 : i32
    %c0_i32_0 = arith.constant 0 : i32
    %c0_i32_1 = arith.constant 0 : i32
    return %c0_i32, %c0_i32_0 : i32, i32
  }
  func.func @transform_8(%arg0: i32) -> (i32, i32) {
    %c0_i32 = arith.constant 0 : i32
    %c0_i32_0 = arith.constant 0 : i32
    %c0_i32_1 = arith.constant 0 : i32
    return %c0_i32, %c0_i32_0 : i32, i32
  }
  func.func @transform_9(%arg0: i32) -> (i32, i32) {
    %c0_i32 = arith.constant 0 : i32
    %c0_i32_0 = arith.constant 0 : i32
    %c0_i32_1 = arith.constant 0 : i32
    return %c0_i32, %c0_i32_0 : i32, i32
  }
  func.func @transform_10(%arg0: i32) -> (i32, i32) {
    %c0_i32 = arith.constant 0 : i32
    %c0_i32_0 = arith.constant 0 : i32
    %c0_i32_1 = arith.constant 0 : i32
    return %c0_i32, %c0_i32_0 : i32, i32
  }
  func.func @transform_11(%arg0: i32) -> (i32, i32) {
    %c0_i32 = arith.constant 0 : i32
    %c0_i32_0 = arith.constant 0 : i32
    %c0_i32_1 = arith.constant 0 : i32
    return %c0_i32, %c0_i32_0 : i32, i32
  }
  func.func @transform_12(%arg0: i32) -> (i32, i32) {
    %c0_i32 = arith.constant 0 : i32
    %c0_i32_0 = arith.constant 0 : i32
    %c0_i32_1 = arith.constant 0 : i32
    return %c0_i32, %c0_i32_0 : i32, i32
  }
  func.func @transform_13(%arg0: i32) -> (i32, i32) {
    %c0_i32 = arith.constant 0 : i32
    %c0_i32_0 = arith.constant 0 : i32
    %c0_i32_1 = arith.constant 0 : i32
    return %c0_i32, %c0_i32_0 : i32, i32
  }
  func.func @transform_14(%arg0: i32) -> (i32, i32) {
    %c0_i32 = arith.constant 0 : i32
    %c0_i32_0 = arith.constant 0 : i32
    %c0_i32_1 = arith.constant 0 : i32
    return %c0_i32, %c0_i32_0 : i32, i32
  }
  func.func @transform_15(%arg0: i32) -> (i32, i32) {
    %c0_i32 = arith.constant 0 : i32
    %c0_i32_0 = arith.constant 0 : i32
    %c0_i32_1 = arith.constant 0 : i32
    return %c0_i32, %c0_i32_0 : i32, i32
  }
  func.func @transform_16(%arg0: i32) -> (i32, i32) {
    %c0_i32 = arith.constant 0 : i32
    %c0_i32_0 = arith.constant 0 : i32
    return %c0_i32, %arg0 : i32, i32
  }
  func.func @transform_17(%arg0: i32) -> (i32, i32) {
    %c0_i32 = arith.constant 0 : i32
    %c0_i32_0 = arith.constant 0 : i32
    return %c0_i32, %arg0 : i32, i32
  }
  func.func @transform_18(%arg0: i32) -> (i32, i32, i32) {
    %c0_i32 = arith.constant 0 : i32
    %c0_i32_0 = arith.constant 0 : i32
    %c0_i32_1 = arith.constant 0 : i32
    %c0_i32_2 = arith.constant 0 : i32
    return %c0_i32, %c0_i32_0, %c0_i32_1 : i32, i32, i32
  }
  func.func @transform_19(%arg0: i32) -> (i32, i32) {
    %c0_i32 = arith.constant 0 : i32
    %c0_i32_0 = arith.constant 0 : i32
    %c0_i32_1 = arith.constant 0 : i32
    return %c0_i32, %c0_i32_0 : i32, i32
  }
}

</mosaic_0001>

<bundles_post_ra>
// kernel: tpu_custom_call.1
= control target key start
LH: loop header
LB: loop body
LE: loop exit
PB: predicated region body
PF: predicated region fallthrough
CT: control target
= control target key end

     0   :  { %s5778_s0 = inlined_call_operand.vmem [shape: bf16[8,128], index: 0, kind: input, shape index: {}]   ;;  %s5779_s1 = inlined_call_operand.hbm [shape: f32[8,128], index: 1, kind: input, shape index: {}, may-alias: {1,19}]   ;;  %s5780_s2 = inlined_call_operand.vmem [shape: f32[8,8,128], index: 2, kind: input, shape index: {}]   ;;  %s5781_s3 = inlined_call_operand.hbm [shape: bf16[128,128], index: 3, kind: input, shape index: {}]   ;;  %s5782_s4 = inlined_call_operand.hbm [shape: bf16[128,128], index: 4, kind: input, shape index: {}]   ;;  %s5783_s5 = inlined_call_operand.hbm [shape: bf16[128,128], index: 5, kind: input, shape index: {}]   ;;  %s5784_s6 = inlined_call_operand.hbm [shape: bf16[128,128], index: 6, kind: input, shape index: {}]   ;;  %s5785_s7 = inlined_call_operand.hbm [shape: bf16[128,128], index: 7, kind: input, shape index: {}]   ;;  %s5786_s8 = inlined_call_operand.hbm [shape: bf16[128,128], index: 8, kind: input, shape index: {}]   ;;  %s5787_s9 = inlined_call_operand.hbm [shape: f32[1,128], index: 9, kind: input, shape index: {}]   ;;  %s5788_s10 = inlined_call_operand.hbm [shape: f32[1,128], index: 10, kind: input, shape index: {}]   ;;  %s5789_s11 = inlined_call_operand.hbm [shape: f32[1,128], index: 11, kind: input, shape index: {}]   ;;  %s5790_s12 = inlined_call_operand.hbm [shape: f32[1,128], index: 12, kind: input, shape index: {}]   ;;  %s5791_s13 = inlined_call_operand.hbm [shape: bf16[128,128], index: 13, kind: input, shape index: {}]   ;;  %s5792_s14 = inlined_call_operand.hbm [shape: bf16[128,128], index: 14, kind: input, shape index: {}]   ;;  %s5793_s15 = inlined_call_operand.hbm [shape: f32[1,128], index: 15, kind: input, shape index: {}]   ;;  %s5794_s16 = inlined_call_operand.hbm [shape: bf16[128,256], index: 16, kind: input, shape index: {}]   ;;  %s5795_s17 = inlined_call_operand.hbm [shape: f32[1,256], index: 17, kind: input, shape index: {}]   ;;  %s5796_s18 = inlined_call_operand.hbm [shape: f32[2,8,128], index: 18, kind: output, shape index: {0}]   ;;  %s5797_s19 = inlined_call_operand.hbm [shape: f32[8,128], index: 19, kind: output, shape index: {1}, may-alias: {1,19}]  }
   0x1   :  { %5822 = sst [smem:[#allocation43_spill]] %s5778_s0 }
   0x2   :  { %5823 = sst [smem:[#allocation44_spill]] %s5779_s1 }
   0x3   :  { %5824 = sst [smem:[#allocation45_spill]] %s5780_s2 }
   0x4   :  { %5825 = sst [smem:[#allocation46_spill]] %s5781_s3 }
   0x5   :  { %5826 = sst [smem:[#allocation47_spill]] %s5782_s4 }
   0x6   :  { %5827 = sst [smem:[#allocation48_spill]] %s5783_s5 }
   0x7   :  { %5828 = sst [smem:[#allocation49_spill]] %s5785_s7 }
   0x8   :  { %5829 = sst [smem:[#allocation50_spill]] %s5787_s9 }
   0x9   :  { %5830 = sst [smem:[#allocation51_spill]] %s5788_s10 }
   0xa   :  { %5831 = sst [smem:[#allocation52_spill]] %s5789_s11 }
   0xb   :  { %5832 = sst [smem:[#allocation53_spill]] %s5790_s12 }
   0xc   :  { %5833 = sst [smem:[#allocation54_spill]] %s5791_s13 }
   0xd   :  { %5834 = sst [smem:[#allocation55_spill]] %s5792_s14 }
   0xe   :  { %5835 = sst [smem:[#allocation56_spill]] %s5793_s15 }
   0xf   :  { %5836 = sst [smem:[#allocation57_spill]] %s5795_s17 }
  0x10   :  { %5837 = sst [smem:[#allocation58_spill]] %s5796_s18 }
  0x11   :  { %5838 = sst [smem:[#allocation59_spill]] %s5797_s19 }
  0x12   :  { %25 = vsyncpa [#allocation4], 0 }
  0x13   :  { %26 = vsyncpa [#allocation7], 0 }
  0x14   :  { %27 = vsyncpa [#allocation10], 0 }
  0x15   :  { %28 = vsyncpa [#allocation13], 0 }
  0x16   :  { %29 = vsyncpa [#allocation16], 0 }
  0x17   :  { %30 = vsyncpa [#allocation19], 0 }
  0x18   :  { %31 = vsyncpa [#allocation22], 0 }
  0x19   :  { %32 = vsyncpa [#allocation25], 0 }
  0x1a   :  { %33 = vsyncpa [#allocation5], 0 }
  0x1b   :  { %34 = vsyncpa [#allocation30], 0  ;;  %s5004_s0 = smov 0   ;;  %s5006_s30 = smov 0  }
  0x1c   :  { %s5008_s20 = smov 0   ;;  %s5010_s21 = smov 0  }
  0x1d LB: > { %s4876_s1 = smov [#allocation3]   ;;  %s5025_s2 = sadd.s32 4294967295, %s4874_s21   ;;  %s4874_s21 = sphi %s5010_s21, %s5893_s21   ;;  %s4870_s20 = sphi %s5008_s20, %s5892_s20   ;;  %s4866_s30 = sphi %s5006_s30, %s5891_s30   ;;  %s4862_s0 = sphi %s5004_s0, %s5890_s0  }
  0x1e   : > { %s491_s22 = sshll.u32 %s4876_s1, 4  ;;  %p3460_p0 = scmp.ge.s32.totalorder %s4874_s21, 1  ;;  %s492_s22 = int_to_ptr.vmem [resolvable:$true] %s491_s22 }
  0x1f   : > { %p5805_p1 = scmp.eq.s32.totalorder %s5025_s2, 0  ;;  %p475_p2 = scmp.lt.s32.totalorder %s4874_s21, 3 }
  0x20   : > { %s4877_s24 = smov [#allocation6]   ;;  %s4878_s26 = smov [#allocation9]  }
  0x21   : > { %p5031_p4 = pnand %p3460_p0, %p475_p2  ;;  %s504_s25 = sshll.u32 %s4877_s24, 4  ;;  %s5037_s25 = int_to_ptr.vmem [resolvable:$true] %s504_s25 }
  0x22   : > { %s530_s27 = sshll.u32 %s4878_s26, 4  ;;  %s5842_s1 = sld [smem:[#allocation44_spill]]  ;;  %s5045_s27 = int_to_ptr.vmem [resolvable:$true] %s530_s27 }
  0x23   : > { %s5839_s23 = scalar_select %p5031_p4, 1, 0 }
  0x24   : > { %p4033_p5 = pneg %p5031_p4 }
  0x25   : > { %5840 = sst [smem:[#allocation42_spill]] %s5839_s23 }
  0x26   : > { %p5041_p6 = pnand %p4033_p5, %p5805_p1 }
  0x28   : > { %s5841_s3 = scalar_select %p5041_p6, 1, 0 }
  0x29   : > { %s4296_s19 = scalar_lea.hbm %s5842_s1, 128  ;;  %p5055_p8 = pneg %p5041_p6 }
  0x2a   : > { %p4297_p7 = scmp.ne.s32.totalorder %s5842_s1, %s4296_s19  ;;  %p4303_p11 = scmp.lt.u32.totalorder %s4296_s19, %s5842_s1 }
  0x2c   : > { %p4299_p9 = pnand %p5055_p8, %p4297_p7 }
  0x2e   : > { %p4300_p10 = pneg %p4299_p9 }
  0x30   : > { %p4305_p12 = pnand %p4303_p11, %p4300_p10 }
  0x32   : > { %4308 = shalt.err (!%p4305_p12)
}
  0x33   : > { %s4309_s28 = scalar_lea.vmem %s492_s22, 128  ;;  %p4317_p5 = scmp.lt.s32.totalorder %s492_s22, %s492_s22 }
  0x34   : > { %p4310_p13 = scmp.ne.s32.totalorder %s492_s22, %s4309_s28  ;;  %p4318_p3 = scmp.lt.s32.totalorder %s4309_s28, %s4309_s28 }
  0x36   : > { %p4312_p0 = pnand %p4310_p13, %p5055_p8  ;;  %p4319_p1 = por %p4318_p3, %p4317_p5 }
  0x38   : > { %p4313_p2 = pneg %p4312_p0 }
  0x3a   : > { %p4320_p4 = pnand %p4319_p1, %p4313_p2 }
  0x3c   : > { %4323 = shalt.err (!%p4320_p4)
}
  0x3d   : > { %4036 = dma.hbm_to_vmem [thread:$0]  (!%p5041_p6), %s5842_s1, 128, %s492_s22, [#allocation4]  }
  0x3e   : > { %s5844_s29 = sld [smem:[#allocation46_spill]] }
  0x44   : > { %s4324_s26 = scalar_lea.hbm %s5844_s29, 1024 }
  0x45   : > { %p4325_p7 = scmp.ne.s32.totalorder %s5844_s29, %s4324_s26  ;;  %p4331_p1 = scmp.lt.u32.totalorder %s4324_s26, %s5844_s29 }
  0x47   : > { %p4327_p9 = pnand %p4325_p7, %p5055_p8 }
  0x49   : > { %p4328_p3 = pneg %p4327_p9 }
  0x4b   : > { %p4333_p4 = pnand %p4331_p1, %p4328_p3 }
  0x4d   : > { %4336 = shalt.err (!%p4333_p4)
}
  0x4e   : > { %s4337_s22 = scalar_lea.vmem %s5037_s25, 1024  ;;  %p4345_p13 = scmp.lt.s32.totalorder %s5037_s25, %s5037_s25 }
  0x4f   : > { %p4338_p10 = scmp.ne.s32.totalorder %s5037_s25, %s4337_s22  ;;  %p4346_p0 = scmp.lt.s32.totalorder %s4337_s22, %s4337_s22 }
  0x51   : > { %p4340_p11 = pnand %p4338_p10, %p5055_p8  ;;  %p4347_p2 = por %p4346_p0, %p4345_p13 }
  0x53   : > { %p4341_p12 = pneg %p4340_p11 }
  0x55   : > { %p4348_p5 = pnand %p4347_p2, %p4341_p12 }
  0x57   : > { %4351 = shalt.err (!%p4348_p5)
}
  0x58   : > { %s5820_s14 = smov 64   ;;  %s4880_s12 = smov 4  }
  0x59   : > { %4039 = dma.hbm_to_vmem [thread:$0]  (!%p5041_p6), %s5844_s29, 1024, %s5037_s25, [#allocation7], %s5820_s14, %s5820_s14, %s4880_s12  }
  0x5a   : > { %s5845_s5 = sld [smem:[#allocation48_spill]] }
  0x60   : > { %s4352_s19 = scalar_lea.hbm %s5845_s5, 1024 }
  0x61   : > { %p4353_p7 = scmp.ne.s32.totalorder %s5845_s5, %s4352_s19  ;;  %p4359_p1 = scmp.lt.u32.totalorder %s4352_s19, %s5845_s5 }
  0x63   : > { %p4355_p9 = pnand %p4353_p7, %p5055_p8 }
  0x65   : > { %p4356_p3 = pneg %p4355_p9 }
  0x67   : > { %p4361_p4 = pnand %p4359_p1, %p4356_p3 }
  0x69   : > { %4364 = shalt.err (!%p4361_p4)
}
  0x6a   : > { %s4365_s25 = scalar_lea.vmem %s5045_s27, 1024  ;;  %p4373_p13 = scmp.lt.s32.totalorder %s5045_s27, %s5045_s27 }
  0x6b   : > { %p4366_p10 = scmp.ne.s32.totalorder %s5045_s27, %s4365_s25  ;;  %p4374_p0 = scmp.lt.s32.totalorder %s4365_s25, %s4365_s25 }
  0x6d   : > { %p4368_p11 = pnand %p4366_p10, %p5055_p8  ;;  %p4375_p2 = por %p4374_p0, %p4373_p13 }
  0x6f   : > { %p4369_p12 = pneg %p4368_p11 }
  0x71   : > { %p4376_p5 = pnand %p4375_p2, %p4369_p12 }
  0x73   : > { %4379 = shalt.err (!%p4376_p5)
}
  0x74   : > { %4045 = dma.hbm_to_vmem [thread:$0]  (!%p5041_p6), %s5845_s5, 1024, %s5045_s27, [#allocation10], %s5820_s14, %s5820_s14, %s4880_s12  }
  0x75   : > { %s4881_s18 = smov [#allocation12]   ;;  %s4882_s17 = smov [#allocation15]  }
  0x76   : > { %s556_s23 = sshll.u32 %s4881_s18, 4  ;;  %s583_s19 = sshll.u32 %s4882_s17, 4  ;;  %s557_s23 = int_to_ptr.vmem [resolvable:$true] %s556_s23  ;;  %s584_s19 = int_to_ptr.vmem [resolvable:$true] %s583_s19 }
  0x77   : > { %s5846_s7 = sld [smem:[#allocation49_spill]] }
  0x7d   : > { %s4380_s22 = scalar_lea.hbm %s5846_s7, 1024 }
  0x7e   : > { %p4381_p7 = scmp.ne.s32.totalorder %s5846_s7, %s4380_s22  ;;  %p4387_p1 = scmp.lt.u32.totalorder %s4380_s22, %s5846_s7 }
  0x80   : > { %p4383_p9 = pnand %p4381_p7, %p5055_p8 }
  0x82   : > { %p4384_p3 = pneg %p4383_p9 }
  0x84   : > { %p4389_p4 = pnand %p4387_p1, %p4384_p3 }
  0x86   : > { %4392 = shalt.err (!%p4389_p4)
}
  0x87   : > { %s4393_s27 = scalar_lea.vmem %s557_s23, 1024  ;;  %p4401_p13 = scmp.lt.s32.totalorder %s557_s23, %s557_s23 }
  0x88   : > { %p4394_p10 = scmp.ne.s32.totalorder %s557_s23, %s4393_s27  ;;  %p4402_p0 = scmp.lt.s32.totalorder %s4393_s27, %s4393_s27 }
  0x8a   : > { %p4396_p11 = pnand %p4394_p10, %p5055_p8  ;;  %p4403_p2 = por %p4402_p0, %p4401_p13 }
  0x8c   : > { %p4397_p12 = pneg %p4396_p11 }
  0x8e   : > { %p4404_p5 = pnand %p4403_p2, %p4397_p12 }
  0x90   : > { %4407 = shalt.err (!%p4404_p5)
}
  0x91   : > { %4051 = dma.hbm_to_vmem [thread:$0]  (!%p5041_p6), %s5846_s7, 1024, %s557_s23, [#allocation13], %s5820_s14, %s5820_s14, %s4880_s12  }
  0x92   : > { %s5847_s9 = sld [smem:[#allocation50_spill]] }
  0x98   : > { %s4408_s17 = scalar_lea.hbm %s5847_s9, 16 }
  0x99   : > { %p4409_p7 = scmp.ne.s32.totalorder %s5847_s9, %s4408_s17  ;;  %p4415_p1 = scmp.lt.u32.totalorder %s4408_s17, %s5847_s9 }
  0x9b   : > { %p4411_p9 = pnand %p4409_p7, %p5055_p8 }
  0x9d   : > { %p4412_p3 = pneg %p4411_p9 }
  0x9f   : > { %p4417_p4 = pnand %p4415_p1, %p4412_p3 }
  0xa1   : > { %4420 = shalt.err (!%p4417_p4)
}
  0xa2   : > { %s4421_s1 = scalar_lea.vmem %s584_s19, 16  ;;  %s4428_s23 = scalar_lea.vmem %s584_s19, 32 }
  0xa3   : > { %p4422_p10 = scmp.ne.s32.totalorder %s584_s19, %s4421_s1  ;;  %p4429_p13 = scmp.lt.s32.totalorder %s584_s19, %s584_s19 }
  0xa4   : > { %p4430_p0 = scmp.lt.s32.totalorder %s4428_s23, %s4421_s1 }
  0xa5   : > { %p4424_p11 = pnand %p4422_p10, %p5055_p8 }
  0xa6   : > { %p4431_p2 = por %p4430_p0, %p4429_p13 }
  0xa7   : > { %p4425_p12 = pneg %p4424_p11 }
  0xa9   : > { %p4432_p5 = pnand %p4431_p2, %p4425_p12 }
  0xab   : > { %4435 = shalt.err (!%p4432_p5)
}
  0xac   : > { %4057 = dma.hbm_to_vmem [thread:$0]  (!%p5041_p6), %s5847_s9, 16, %s584_s19, [#allocation16]  }
  0xad   : > { %s4883_s29 = smov [#allocation18]   ;;  %s4884_s18 = smov [#allocation21]  }
  0xae   : > { %s605_s15 = sshll.u32 %s4883_s29, 4  ;;  %s626_s17 = sshll.u32 %s4884_s18, 4  ;;  %s606_s15 = int_to_ptr.vmem [resolvable:$true] %s605_s15  ;;  %s627_s17 = int_to_ptr.vmem [resolvable:$true] %s626_s17 }
  0xaf   : > { %s5848_s11 = sld [smem:[#allocation52_spill]] }
  0xb5   : > { %s4436_s22 = scalar_lea.hbm %s5848_s11, 16 }
  0xb6   : > { %p4437_p7 = scmp.ne.s32.totalorder %s5848_s11, %s4436_s22  ;;  %p4443_p1 = scmp.lt.u32.totalorder %s4436_s22, %s5848_s11 }
  0xb8   : > { %p4439_p9 = pnand %p4437_p7, %p5055_p8 }
  0xba   : > { %p4440_p3 = pneg %p4439_p9 }
  0xbc   : > { %p4445_p4 = pnand %p4443_p1, %p4440_p3 }
  0xbe   : > { %4448 = shalt.err (!%p4445_p4)
}
  0xbf   : > { %s4449_s19 = scalar_lea.vmem %s606_s15, 16  ;;  %s4456_s10 = scalar_lea.vmem %s606_s15, 32 }
  0xc0   : > { %p4450_p10 = scmp.ne.s32.totalorder %s606_s15, %s4449_s19  ;;  %p4457_p13 = scmp.lt.s32.totalorder %s606_s15, %s606_s15 }
  0xc1   : > { %p4458_p0 = scmp.lt.s32.totalorder %s4456_s10, %s4449_s19 }
  0xc2   : > { %p4452_p11 = pnand %p4450_p10, %p5055_p8 }
  0xc3   : > { %p4459_p2 = por %p4458_p0, %p4457_p13 }
  0xc4   : > { %p4453_p12 = pneg %p4452_p11 }
  0xc6   : > { %p4460_p5 = pnand %p4459_p2, %p4453_p12 }
  0xc8   : > { %4463 = shalt.err (!%p4460_p5)
}
  0xc9   : > { %4063 = dma.hbm_to_vmem [thread:$0]  (!%p5041_p6), %s5848_s11, 16, %s606_s15, [#allocation19]  }
  0xca   : > { %s5849_s13 = sld [smem:[#allocation54_spill]] }
  0xd0   : > { %s4464_s22 = scalar_lea.hbm %s5849_s13, 1024 }
  0xd1   : > { %p4465_p7 = scmp.ne.s32.totalorder %s5849_s13, %s4464_s22  ;;  %p4471_p1 = scmp.lt.u32.totalorder %s4464_s22, %s5849_s13 }
  0xd3   : > { %p4467_p9 = pnand %p4465_p7, %p5055_p8 }
  0xd5   : > { %p4468_p3 = pneg %p4467_p9 }
  0xd7   : > { %p4473_p4 = pnand %p4471_p1, %p4468_p3 }
  0xd9   : > { %4476 = shalt.err (!%p4473_p4)
}
  0xda   : > { %s4477_s19 = scalar_lea.vmem %s627_s17, 1024  ;;  %p4485_p13 = scmp.lt.s32.totalorder %s627_s17, %s627_s17 }
  0xdb   : > { %p4478_p10 = scmp.ne.s32.totalorder %s627_s17, %s4477_s19  ;;  %p4486_p0 = scmp.lt.s32.totalorder %s4477_s19, %s4477_s19 }
  0xdd   : > { %p4480_p11 = pnand %p4478_p10, %p5055_p8  ;;  %p4487_p2 = por %p4486_p0, %p4485_p13 }
  0xdf   : > { %p4481_p12 = pneg %p4480_p11 }
  0xe1   : > { %p4488_p5 = pnand %p4487_p2, %p4481_p12 }
  0xe3   : > { %4491 = shalt.err (!%p4488_p5)
}
  0xe4   : > { %4069 = dma.hbm_to_vmem [thread:$0]  (!%p5041_p6), %s5849_s13, 1024, %s627_s17, [#allocation22], %s5820_s14, %s5820_s14, %s4880_s12  }
  0xe5   : > { %s5202_s29 = sadd.s32 1, %s4874_s21   ;;  %s383_s26 = sadd.s32 1, %s4870_s20 }
  0xe6   : > { %s380_s18 = ssub.s32 %s4874_s21, %s5202_s29  ;;  %p390_p9 = scmp.ne.s32.totalorder %s4870_s20, %s4866_s30 }
  0xe7   : > { %p381_p7 = scmp.eq.s32.totalorder %s380_s18, 0  ;;  %p391_p3 = scmp.eq.s32.totalorder %s4874_s21, 0 }
  0xe8   : > { %p396_p1 = scmp.ne.s32.totalorder %s4866_s30, %s4862_s0  ;;  %p5850_p10 = scmp.eq.s32.totalorder %s5025_s2, 0 }
  0xe9   : > { %s5213_s28 = scalar_select %p381_p7, %s4870_s20, %s383_s26  }
  0xea   : > { %p392_p4 = por %p391_p3, %p390_p9  ;;  %p5217_p11 = por %p5850_p10, %p396_p1 }
  0xeb   : > { %p4097_p12 = scmp.lt.s32.totalorder %s4874_s21, 2  ;;  %s664_s25 = sand.u32 1, %s4874_s21  }
  0xec   : > { %s5851_s22 = scalar_select %p5217_p11, 1, 0 }
  0xed   : > { %s5813_s17 = sand.u32 1, %s4870_s20   ;;  %s3477_s23 = sshll.u32 %s4874_s21, 6 }
  0xee   : > { %s3476_s1 = sshll.u32 %s5813_s17, 6  ;;  %s5230_s15 = scalar_lea.hbm %s5794_s16, %s3477_s23 }
  0xef   : > { %s668_s0 = scalar_lea.vmem [#allocation26], %s3476_s1  ;;  %p5232_p13 = pnand %p4097_p12, %p392_p4 }
  0xf0   : > { %s674_s10 = sshll.u32 %s668_s0, 4  ;;  %s5238_s26 = scalar_lea.sflag [#allocation4], %s664_s25  ;;  %s5236_s10 = int_to_ptr.vmem [resolvable:$true] %s674_s10 }
  0xf1   : > { %s5852_s18 = scalar_select %p5232_p13, 1, 0 }
  0xf2   : > { %s4492_s17 = scalar_lea.hbm %s5230_s15, 1024  ;;  %p5817_p2 = pneg %p5232_p13 }
  0xf3   : > { %p4493_p0 = scmp.ne.s32.totalorder %s5230_s15, %s4492_s17  ;;  %s4497_s27 = scalar_lea.hbm %s5794_s16, 2048 }
  0xf4   : > { %p4498_p9 = scmp.lt.u32.totalorder %s5230_s15, %s5794_s16  ;;  %p4499_p3 = scmp.lt.u32.totalorder %s4497_s27, %s4492_s17 }
  0xf5   : > { %p4495_p5 = pnand %p5817_p2, %p4493_p0  ;;  %p4501_p4 = scmp.lt.u32.totalorder %s4492_s17, %s5230_s15 }
  0xf6   : > { %p4500_p1 = por %p4499_p3, %p4498_p9 }
  0xf7   : > { %p4496_p7 = pneg %p4495_p5 }
  0xf8   : > { %p4502_p10 = por %p4501_p4, %p4500_p1 }
  0xfa   : > { %p4503_p12 = pnand %p4502_p10, %p4496_p7 }
  0xfc   : > { %4506 = shalt.err (!%p4503_p12)
}
  0xfd   : > { %s4507_s25 = scalar_lea.vmem %s5236_s10, 1024  ;;  %s4885_s1 = smov [#allocation26]  }
  0xfe   : > { %p4508_p0 = scmp.ne.s32.totalorder %s5236_s10, %s4507_s25  ;;  %s4512_s23 = sshll.u32 %s4885_s1, 4  ;;  %s4513_s23 = int_to_ptr.vmem [resolvable:$false] %s4512_s23 }
  0xff   : > { %s4514_s19 = scalar_lea.vmem %s4513_s23, 2048  ;;  %p4515_p6 = scmp.lt.s32.totalorder %s5236_s10, %s4513_s23 }
 0x100   : > { %p4510_p5 = pnand %p4508_p0, %p5817_p2  ;;  %p4516_p9 = scmp.lt.s32.totalorder %s4514_s19, %s4507_s25 }
 0x102   : > { %p4511_p11 = pneg %p4510_p5  ;;  %p4517_p3 = por %p4516_p9, %p4515_p6 }
 0x104   : > { %p4518_p1 = pnand %p4517_p3, %p4511_p11 }
 0x106   : > { %4521 = shalt.err (!%p4518_p1)
}
 0x107   : > { %s4886_s17 = smov 128   ;;  %s4887_s27 = smov [#allocation8]  }
 0x108   : > { %4079 = dma.hbm_to_vmem [thread:$0]  (!%p5232_p13), %s5230_s15, 1024, %s5236_s10, %s5238_s26, %s4886_s17, %s5820_s14, %s4880_s12  }
 0x109   : > { %s517_s0 = sshll.u32 %s4887_s27, 4  ;;  %s4888_s1 = smov [#allocation11]   ;;  %s518_s0 = int_to_ptr.vmem [resolvable:$true] %s517_s0 }
 0x10a   : > { %s543_s5 = sshll.u32 %s4888_s1, 4  ;;  %s5853_s4 = sld [smem:[#allocation47_spill]]  ;;  %s544_s5 = int_to_ptr.vmem [resolvable:$true] %s543_s5 }
 0x110   : > { %s4522_s19 = scalar_lea.hbm %s5853_s4, 1024 }
 0x111   : > { %p4523_p6 = scmp.ne.s32.totalorder %s5853_s4, %s4522_s19  ;;  %p4529_p4 = scmp.lt.u32.totalorder %s4522_s19, %s5853_s4 }
 0x113   : > { %p4525_p11 = pnand %p4523_p6, %p5055_p8 }
 0x115   : > { %p4526_p7 = pneg %p4525_p11 }
 0x117   : > { %p4531_p10 = pnand %p4529_p4, %p4526_p7 }
 0x119   : > { %4534 = shalt.err (!%p4531_p10)
}
 0x11a   : > { %s4535_s15 = scalar_lea.vmem %s518_s0, 1024  ;;  %p4543_p9 = scmp.lt.s32.totalorder %s518_s0, %s518_s0 }
 0x11b   : > { %p4536_p12 = scmp.ne.s32.totalorder %s518_s0, %s4535_s15  ;;  %p4544_p3 = scmp.lt.s32.totalorder %s4535_s15, %s4535_s15 }
 0x11d   : > { %p4538_p0 = pnand %p4536_p12, %p5055_p8  ;;  %p4545_p1 = por %p4544_p3, %p4543_p9 }
 0x11f   : > { %p4539_p5 = pneg %p4538_p0 }
 0x121   : > { %p4546_p2 = pnand %p4545_p1, %p4539_p5 }
 0x123   : > { %4549 = shalt.err (!%p4546_p2)
}
 0x124   : > { %p5854_p6 = scmp.ne.s32.totalorder %s5841_s3, 0  ;;  %s4550_s10 = scalar_lea.hbm %s5784_s6, 1024 }
 0x125   : > { %p4551_p11 = scmp.ne.s32.totalorder %s5784_s6, %s4550_s10  ;;  %p4557_p4 = scmp.lt.u32.totalorder %s4550_s10, %s5784_s6 }
 0x126   : > { %4042 = dma.hbm_to_vmem [thread:$0]  (!%p5854_p6), %s5853_s4, 1024, %s518_s0, [#allocation7], %s5820_s14, %s5820_s14, %s4880_s12  }
 0x127   : > { %p4553_p2 = pnand %p4551_p11, %p5055_p8 }
 0x129   : > { %p4554_p7 = pneg %p4553_p2 }
 0x12b   : > { %p4559_p10 = pnand %p4557_p4, %p4554_p7 }
 0x12d   : > { %4562 = shalt.err (!%p4559_p10)
}
 0x12e   : > { %s4563_s25 = scalar_lea.vmem %s544_s5, 1024  ;;  %p4571_p9 = scmp.lt.s32.totalorder %s544_s5, %s544_s5 }
 0x12f   : > { %p4564_p12 = scmp.ne.s32.totalorder %s544_s5, %s4563_s25  ;;  %p4572_p3 = scmp.lt.s32.totalorder %s4563_s25, %s4563_s25 }
 0x131   : > { %p4566_p0 = pnand %p4564_p12, %p5055_p8  ;;  %p4573_p1 = por %p4572_p3, %p4571_p9 }
 0x133   : > { %p4567_p5 = pneg %p4566_p0 }
 0x135   : > { %p4574_p13 = pnand %p4573_p1, %p4567_p5 }
 0x137   : > { %4577 = shalt.err (!%p4574_p13)
}
 0x138   : > { %4048 = dma.hbm_to_vmem [thread:$0]  (!%p5854_p6), %s5784_s6, 1024, %s544_s5, [#allocation10], %s5820_s14, %s5820_s14, %s4880_s12  }
 0x139   : > { %s4889_s15 = smov [#allocation14]   ;;  %s4890_s9 = smov [#allocation17]  }
 0x13a   : > { %s569_s7 = sshll.u32 %s4889_s15, 4  ;;  %s594_s11 = sshll.u32 %s4890_s9, 4  ;;  %s570_s7 = int_to_ptr.vmem [resolvable:$true] %s569_s7  ;;  %s595_s11 = int_to_ptr.vmem [resolvable:$true] %s594_s11 }
 0x13b   : > { %s4578_s17 = scalar_lea.hbm %s5786_s8, 1024 }
 0x13c   : > { %p4579_p13 = scmp.ne.s32.totalorder %s5786_s8, %s4578_s17  ;;  %p4585_p7 = scmp.lt.u32.totalorder %s4578_s17, %s5786_s8 }
 0x13e   : > { %p4581_p11 = pnand %p4579_p13, %p5055_p8 }
 0x140   : > { %p4582_p2 = pneg %p4581_p11 }
 0x142   : > { %p4587_p4 = pnand %p4585_p7, %p4582_p2 }
 0x144   : > { %4590 = shalt.err (!%p4587_p4)
}
 0x145   : > { %s4591_s5 = scalar_lea.vmem %s570_s7, 1024  ;;  %p4599_p5 = scmp.lt.s32.totalorder %s570_s7, %s570_s7 }
 0x146   : > { %p4592_p10 = scmp.ne.s32.totalorder %s570_s7, %s4591_s5  ;;  %p4600_p9 = scmp.lt.s32.totalorder %s4591_s5, %s4591_s5 }
 0x148   : > { %p4594_p12 = pnand %p4592_p10, %p5055_p8  ;;  %p4601_p3 = por %p4600_p9, %p4599_p5 }
 0x14a   : > { %p4595_p0 = pneg %p4594_p12 }
 0x14c   : > { %p4602_p1 = pnand %p4601_p3, %p4595_p0 }
 0x14e   : > { %4605 = shalt.err (!%p4602_p1)
}
 0x14f   : > { %4054 = dma.hbm_to_vmem [thread:$0]  (!%p5854_p6), %s5786_s8, 1024, %s570_s7, [#allocation13], %s5820_s14, %s5820_s14, %s4880_s12  }
 0x150   : > { %s5855_s13 = sld [smem:[#allocation51_spill]] }
 0x156   : > { %s4606_s10 = scalar_lea.hbm %s5855_s13, 16 }
 0x157   : > { %p4607_p13 = scmp.ne.s32.totalorder %s5855_s13, %s4606_s10  ;;  %p4613_p7 = scmp.lt.u32.totalorder %s4606_s10, %s5855_s13 }
 0x159   : > { %p4609_p11 = pnand %p4607_p13, %p5055_p8 }
 0x15b   : > { %p4610_p2 = pneg %p4609_p11 }
 0x15d   : > { %p4615_p4 = pnand %p4613_p7, %p4610_p2 }
 0x15f   : > { %4618 = shalt.err (!%p4615_p4)
}
 0x160   : > { %s4619_s25 = scalar_lea.vmem %s595_s11, 16  ;;  %s4626_s7 = scalar_lea.vmem %s595_s11, 32 }
 0x161   : > { %p4620_p10 = scmp.ne.s32.totalorder %s595_s11, %s4619_s25  ;;  %p4627_p5 = scmp.lt.s32.totalorder %s595_s11, %s595_s11 }
 0x162   : > { %p4628_p9 = scmp.lt.s32.totalorder %s4626_s7, %s4619_s25 }
 0x163   : > { %p4622_p12 = pnand %p4620_p10, %p5055_p8 }
 0x164   : > { %p4629_p3 = por %p4628_p9, %p4627_p5 }
 0x165   : > { %p4623_p0 = pneg %p4622_p12 }
 0x167   : > { %p4630_p1 = pnand %p4629_p3, %p4623_p0 }
 0x169   : > { %4633 = shalt.err (!%p4630_p1)
}
 0x16a   : > { %4060 = dma.hbm_to_vmem [thread:$0]  (!%p5854_p6), %s5855_s13, 16, %s595_s11, [#allocation16]  }
 0x16b   : > { %s4891_s19 = smov [#allocation20]   ;;  %s4892_s9 = smov [#allocation23]  }
 0x16c   : > { %s616_s15 = sshll.u32 %s4891_s19, 4  ;;  %s639_s10 = sshll.u32 %s4892_s9, 4  ;;  %s617_s15 = int_to_ptr.vmem [resolvable:$true] %s616_s15  ;;  %s640_s10 = int_to_ptr.vmem [resolvable:$true] %s639_s10 }
 0x16d   : > { %s5856_s1 = sld [smem:[#allocation53_spill]] }
 0x173   : > { %s4634_s23 = scalar_lea.hbm %s5856_s1, 16 }
 0x174   : > { %p4635_p13 = scmp.ne.s32.totalorder %s5856_s1, %s4634_s23  ;;  %p4641_p7 = scmp.lt.u32.totalorder %s4634_s23, %s5856_s1 }
 0x176   : > { %p4637_p11 = pnand %p4635_p13, %p5055_p8 }
 0x178   : > { %p4638_p2 = pneg %p4637_p11 }
 0x17a   : > { %p4643_p4 = pnand %p4641_p7, %p4638_p2 }
 0x17c   : > { %4646 = shalt.err (!%p4643_p4)
}
 0x17d   : > { %s4647_s11 = scalar_lea.vmem %s617_s15, 16  ;;  %s4654_s0 = scalar_lea.vmem %s617_s15, 32 }
 0x17e   : > { %p4648_p10 = scmp.ne.s32.totalorder %s617_s15, %s4647_s11  ;;  %p4655_p5 = scmp.lt.s32.totalorder %s617_s15, %s617_s15 }
 0x17f   : > { %p4656_p9 = scmp.lt.s32.totalorder %s4654_s0, %s4647_s11 }
 0x180   : > { %p4650_p12 = pnand %p4648_p10, %p5055_p8 }
 0x181   : > { %p4657_p3 = por %p4656_p9, %p4655_p5 }
 0x182   : > { %p4651_p0 = pneg %p4650_p12 }
 0x184   : > { %p4658_p1 = pnand %p4657_p3, %p4651_p0 }
 0x186   : > { %4661 = shalt.err (!%p4658_p1)
}
 0x187   : > { %4066 = dma.hbm_to_vmem [thread:$0]  (!%p5854_p6), %s5856_s1, 16, %s617_s15, [#allocation19]  }
 0x188   : > { %s5857_s27 = sld [smem:[#allocation55_spill]] }
 0x18e   : > { %s4662_s23 = scalar_lea.hbm %s5857_s27, 1024 }
 0x18f   : > { %p4663_p13 = scmp.ne.s32.totalorder %s5857_s27, %s4662_s23  ;;  %p4669_p7 = scmp.lt.u32.totalorder %s4662_s23, %s5857_s27 }
 0x191   : > { %p4665_p11 = pnand %p4663_p13, %p5055_p8 }
 0x193   : > { %p4666_p2 = pneg %p4665_p11 }
 0x195   : > { %p4671_p4 = pnand %p4669_p7, %p4666_p2 }
 0x197   : > { %4674 = shalt.err (!%p4671_p4)
}
 0x198   : > { %s4675_s0 = scalar_lea.vmem %s640_s10, 1024  ;;  %p4683_p5 = scmp.lt.s32.totalorder %s640_s10, %s640_s10 }
 0x199   : > { %p4676_p10 = scmp.ne.s32.totalorder %s640_s10, %s4675_s0  ;;  %p4684_p9 = scmp.lt.s32.totalorder %s4675_s0, %s4675_s0 }
 0x19b   : > { %p4678_p12 = pnand %p4676_p10, %p5055_p8  ;;  %p4685_p3 = por %p4684_p9, %p4683_p5 }
 0x19d   : > { %p4679_p0 = pneg %p4678_p12 }
 0x19f   : > { %p4686_p1 = pnand %p4685_p3, %p4679_p0 }
 0x1a1   : > { %4689 = shalt.err (!%p4686_p1)
}
 0x1a2   : > { %s5858_s15 = smov 64   ;;  %s4893_s14 = smov [#allocation24]  }
 0x1a3   : > { %4072 = dma.hbm_to_vmem [thread:$0]  (!%p5854_p6), %s5857_s27, 1024, %s640_s10, [#allocation22], %s5858_s15, %s5858_s15, %s4880_s12  }
 0x1a4   : > { %s653_s17 = sshll.u32 %s4893_s14, 4  ;;  %s3478_s23 = sshll.u32 %s4874_s21, 4  ;;  %s654_s17 = int_to_ptr.vmem [resolvable:$true] %s653_s17 }
 0x1a5   : > { %s5859_s5 = sld [smem:[#allocation56_spill]] }
 0x1ab   : > { %s4690_s11 = scalar_lea.hbm %s5859_s5, 16 }
 0x1ac   : > { %p4691_p13 = scmp.ne.s32.totalorder %s5859_s5, %s4690_s11  ;;  %p4697_p7 = scmp.lt.u32.totalorder %s4690_s11, %s5859_s5 }
 0x1ae   : > { %p4693_p11 = pnand %p4691_p13, %p5055_p8 }
 0x1b0   : > { %p4694_p2 = pneg %p4693_p11 }
 0x1b2   : > { %p4699_p4 = pnand %p4697_p7, %p4694_p2 }
 0x1b4   : > { %4702 = shalt.err (!%p4699_p4)
}
 0x1b5   : > { %s4703_s12 = scalar_lea.vmem %s654_s17, 16  ;;  %s4710_s21 = scalar_lea.vmem %s654_s17, 32 }
 0x1b6   : > { %p4704_p10 = scmp.ne.s32.totalorder %s654_s17, %s4703_s12  ;;  %p4711_p5 = scmp.lt.s32.totalorder %s654_s17, %s654_s17 }
 0x1b7   : > { %p4712_p9 = scmp.lt.s32.totalorder %s4710_s21, %s4703_s12 }
 0x1b8   : > { %p4706_p12 = pnand %p4704_p10, %p5055_p8 }
 0x1b9   : > { %p4713_p3 = por %p4712_p9, %p4711_p5 }
 0x1ba   : > { %p4707_p0 = pneg %p4706_p12 }
 0x1bc   : > { %p4714_p1 = pnand %p4713_p3, %p4707_p0 }
 0x1be   : > { %4717 = shalt.err (!%p4714_p1)
}
 0x1bf   : > { %4075 = dma.hbm_to_vmem [thread:$0]  (!%p5854_p6), %s5859_s5, 16, %s654_s17, [#allocation25]  }
 0x1c0   : > { %s5860_s9 = sld [smem:[#allocation57_spill]]  ;;  %s5861_s14 = sand.u32 1, %s4870_s20  }
 0x1c1   : > { %s687_s25 = scalar_lea.vmem [#allocation27], %s5861_s14  ;;  %p5862_p13 = scmp.ne.s32.totalorder %s5852_s18, 0 }
 0x1c2   : > { %s694_s7 = sshll.u32 %s687_s25, 4  ;;  %s695_s7 = int_to_ptr.vmem [resolvable:$true] %s694_s7 }
 0x1c3   : > { %p5863_p11 = pneg %p5862_p13 }
 0x1c6   : > { %s5410_s24 = scalar_lea.hbm %s5860_s9, %s3478_s23  ;;  %s4723_s0 = scalar_lea.hbm %s5860_s9, 32 }
 0x1c7   : > { %s4718_s3 = scalar_lea.hbm %s5410_s24, 16  ;;  %p4724_p6 = scmp.lt.u32.totalorder %s5410_s24, %s5860_s9 }
 0x1c8   : > { %p4719_p8 = scmp.ne.s32.totalorder %s5410_s24, %s4718_s3  ;;  %p4725_p4 = scmp.lt.u32.totalorder %s4723_s0, %s4718_s3 }
 0x1c9   : > { %p4727_p12 = scmp.lt.u32.totalorder %s4718_s3, %s5410_s24 }
 0x1ca   : > { %p4721_p2 = pnand %p4719_p8, %p5863_p11  ;;  %p4726_p10 = por %p4725_p4, %p4724_p6 }
 0x1cc   : > { %p4722_p7 = pneg %p4721_p2  ;;  %p4728_p0 = por %p4727_p12, %p4726_p10 }
 0x1ce   : > { %p4729_p5 = pnand %p4728_p0, %p4722_p7 }
 0x1d0   : > { %4732 = shalt.err (!%p4729_p5)
}
 0x1d1   : > { %s4733_s12 = scalar_lea.vmem %s695_s7, 16  ;;  %p5864_p3 = pmov %p5863_p11 }
 0x1d2   : > { %p4734_p9 = scmp.ne.s32.totalorder %s695_s7, %s4733_s12  ;;  %s4894_s21 = smov [#allocation27]  }
 0x1d3   : > { %s4738_s10 = sshll.u32 %s4894_s21, 4  ;;  %s4739_s10 = int_to_ptr.vmem [resolvable:$false] %s4738_s10 }
 0x1d4   : > { %p4736_p1 = pnand %p4734_p9, %p5864_p3  ;;  %s4740_s1 = scalar_lea.vmem %s4739_s10, 32 }
 0x1d5   : > { %p4741_p11 = scmp.lt.s32.totalorder %s695_s7, %s4739_s10  ;;  %p4742_p2 = scmp.lt.s32.totalorder %s4740_s1, %s4733_s12 }
 0x1d6   : > { %p4737_p8 = pneg %p4736_p1 }
 0x1d7   : > { %p4743_p4 = por %p4742_p2, %p4741_p11 }
 0x1d9   : > { %p4744_p6 = pnand %p4743_p4, %p4737_p8 }
 0x1db   : > { %4747 = shalt.err (!%p4744_p6)
}
 0x1dc   : > { %4082 = dma.hbm_to_vmem [thread:$0]  (!%p5862_p13), %s5410_s24, 16, %s695_s7, %s5238_s26  }
 0x1dd   : > { %s5865_s4 = sld [smem:[#allocation42_spill]] }
 0x1e3   : > { %p5866_p7 = scmp.ne.s32.totalorder %s5865_s4, 0 }
 0x1e4   : > { %p5867_p10 = scmp.eq.s32.totalorder (!%p5866_p7), %s5025_s2, 0 }
 0x1e5   : > { %703 = sbr.rel (%p5866_p7) target bundleno = 2491 (0x9bb), region = 92 }
 0x1ec   : > { %4817 = dma.done.wait (%p5867_p10), [#allocation4], 128   ;;  %p5868_p12 = pmov %p5867_p10 }
 0x1ed   : > { %p5869_p0 = pmov %p5867_p10 }
 0x1ee   : > { %4819 = vsyncadd (%p5868_p12), [#allocation4], 4294967168 }
 0x1ef   : > { %4821 = dma.done.wait (%p5869_p0), [#allocation7], 2048   ;;  %p5870_p5 = pmov %p5869_p0 }
 0x1f0   : > { %p5871_p9 = pmov %p5869_p0 }
 0x1f1   : > { %4823 = vsyncadd (%p5870_p5), [#allocation7], 4294965248 }
 0x1f2   : > { %4825 = dma.done.wait (%p5871_p9), [#allocation10], 2048   ;;  %p5872_p13 = pmov %p5869_p0 }
 0x1f3   : > { %p5873_p3 = pmov %p5869_p0 }
 0x1f4   : > { %4827 = vsyncadd (%p5872_p13), [#allocation10], 4294965248 }
 0x1f5   : > { %4829 = dma.done.wait (%p5873_p3), [#allocation13], 2048   ;;  %p5874_p1 = pmov %p5869_p0 }
 0x1f6   : > { %p5875_p8 = pmov %p5869_p0 }
 0x1f7   : > { %4831 = vsyncadd (%p5874_p1), [#allocation13], 4294965248 }
 0x1f8   : > { %4833 = dma.done.wait (%p5875_p8), [#allocation16], 32   ;;  %p5876_p11 = pmov %p5869_p0 }
 0x1f9   : > { %p5877_p2 = pmov %p5869_p0 }
 0x1fa   : > { %4835 = vsyncadd (%p5876_p11), [#allocation16], 4294967264 }
 0x1fb   : > { %4837 = dma.done.wait (%p5877_p2), [#allocation19], 32   ;;  %p5878_p4 = pmov %p5869_p0 }
 0x1fc   : > { %p5879_p6 = pmov %p5869_p0 }
 0x1fd   : > { %4839 = vsyncadd (%p5878_p4), [#allocation19], 4294967264 }
 0x1fe   : > { %4841 = dma.done.wait (%p5879_p6), [#allocation22], 2048   ;;  %p5880_p7 = pmov %p5869_p0 }
 0x1ff   : > { %p5881_p10 = pmov %p5869_p0 }
 0x200   : > { %4843 = vsyncadd (%p5880_p7), [#allocation22], 4294965248 }
 0x201   : > { %4845 = dma.done.wait (%p5881_p10), [#allocation25], 16   ;;  %p5882_p12 = pmov %p5869_p0 }
 0x202   : > { %s761_s18 = sand.u32 1, %s5025_s2   ;;  %s763_s26 = sand.u32 1, %s4866_s30  }
 0x203   : > { %4847 = vsyncadd (%p5882_p12), [#allocation25], 4294967280  ;;  %s3494_s15 = sshll.u32 %s763_s26, 6  ;;  %s762_s24 = scalar_lea.sflag [#allocation4], %s761_s18 }
 0x204   : > { %s5470_s14 = scalar_lea.vmem [#allocation26], %s3494_s15  ;;  %p5883_p0 = scmp.ne.s32.totalorder %s5851_s22, 0 }
 0x206   : > { %4849 = dma.done.wait (%p5883_p0), %s762_s24, 1040  }
 0x207   : > { %4851 = vsyncadd (%p5883_p0), %s762_s24, 4294966256  ;;  %s5476_s25 = scalar_lea.vmem [#allocation27], %s763_s26  ;;  %p5884_p5 = scmp.ne.s32.totalorder %s5025_s2, 0 }
 0x208   : > { %v4174_v0 = vld [vmem:[#allocation11] sm:$0xff] (!%p5884_p5)   ;;  %v4895_v1 = vmov (!%p5884_p5), 0.0   ;;  %v4176_v3 = vld [vmem:[#allocation11 + $0x8] sm:$0xff] (!%p5884_p5)   ;;  %vm4896_vm0 = vmmov (!%p5884_p5), 0   ;;  %v4178_v5 = vld [vmem:[#allocation11 + $0x10] sm:$0xff] (!%p5884_p5)   ;;  %s5885_s3 = sld [smem:[#allocation43_spill]] (!%p5884_p5) }
 0x209   : > { %831 = sbr.rel (%p5884_p5) target bundleno = 1848 (0x738), region = 160  ;;  %3705 = vmatprep.subr.bf16.mxu0 (!%p5884_p5), %v4895_v1  ;;  %3725 = vmatprep.subr.bf16.mxu1 (!%p5884_p5), %v4895_v1  ;;  %v4175_v2 = vld [vmem:[#allocation12] sm:$0xff] (!%p5884_p5)   ;;  %v4177_v4 = vld [vmem:[#allocation12 + $0x8] sm:$0xff] (!%p5884_p5)   ;;  %v4179_v6 = vld [vmem:[#allocation12 + $0x10] sm:$0xff] (!%p5884_p5)   ;;  %s5886_s0 = sld [smem:[#allocation45_spill]] (!%p5884_p5)  ;;  %vm2135_vm1 = vcmask (!%p5884_p5), 57344  }
 0x20a   : > { %3706 = vmatpush3.bf16.msra.mxu0 (!%p5884_p5), %v4174_v0  ;;  %3721 = vmatprep.mubr.msk.bf16.mxu0 (!%p5884_p5), %vm4896_vm0, %v4895_v1  ;;  %v4180_v7 = vld [vmem:[#allocation11 + $0x18] sm:$0xff] (!%p5884_p5)   ;;  %v4182_v9 = vld [vmem:[#allocation11 + $0x20] sm:$0xff] (!%p5884_p5)   ;;  %v4184_v11 = vld [vmem:[#allocation11 + $0x28] sm:$0xff] (!%p5884_p5)   ;;  %vm2224_vm2 = vcmask (!%p5884_p5), 64512   ;;  %vm2875_vm3 = vcmask (!%p5884_p5), 1041409   ;;  %vm2878_vm4 = vcmask (!%p5884_p5), 1042434  }
 0x20b   : > { %3726 = vmatpush3.bf16.msra.mxu1 (!%p5884_p5), %v4175_v2  ;;  %3707 = vmatprep.subr.bf16.mxu0 (!%p5884_p5), %v4895_v1  ;;  %v4181_v8 = vld [vmem:[#allocation12 + $0x18] sm:$0xff] (!%p5884_p5)   ;;  %v4183_v10 = vld [vmem:[#allocation12 + $0x20] sm:$0xff] (!%p5884_p5)   ;;  %v4185_v12 = vld [vmem:[#allocation12 + $0x28] sm:$0xff] (!%p5884_p5)   ;;  %vm2881_vm5 = vcmask (!%p5884_p5), 1043459   ;;  %vm2884_vm6 = vcmask (!%p5884_p5), 1044484   ;;  %vm2887_vm7 = vcmask (!%p5884_p5), 1045509  }
 0x20c   : > { %3727 = vmatprep.subr.bf16.mxu1 (!%p5884_p5), %v4895_v1  ;;  %3741 = vmatprep.mubr.msk.bf16.mxu1 (!%p5884_p5), %vm4896_vm0, %v4895_v1  ;;  %v4186_v13 = vld [vmem:[#allocation11 + $0x30] sm:$0xff] (!%p5884_p5)   ;;  %v4188_v15 = vld [vmem:[#allocation11 + $0x38] sm:$0xff] (!%p5884_p5)   ;;  %v4190_v19 = vld [vmem:[#allocation6] sm:$0xff] (!%p5884_p5)   ;;  %vm2890_vm8 = vcmask (!%p5884_p5), 1046534   ;;  %vm2893_vm9 = vcmask (!%p5884_p5), 1047559  }
 0x20d   : > { %v4187_v14 = vld [vmem:[#allocation12 + $0x30] sm:$0xff] (!%p5884_p5)   ;;  %v5498_v16 = vld [vmem:[#allocation3] sm:$0xff] (!%p5884_p5)  ;;  %v4191_v20 = vld [vmem:[#allocation8] sm:$0xff] (!%p5884_p5)  }
 0x20e   : > { %3708 = vmatpush3.bf16.msra.mxu0 (!%p5884_p5), %v4176_v3  ;;  %v4189_v17 = vld [vmem:[#allocation12 + $0x38] sm:$0xff] (!%p5884_p5)   ;;  %v5504_v18 = vpack.c.bf16 (!%p5884_p5), %v5498_v16, %v5498_v16  ;;  %v4192_v21 = vld [vmem:[#allocation6 + $0x8] sm:$0xff] (!%p5884_p5)   ;;  %v4194_v23 = vld [vmem:[#allocation6 + $0x10] sm:$0xff] (!%p5884_p5)  }
 0x20f   : > { %3728 = vmatpush3.bf16.msra.mxu1 (!%p5884_p5), %v4177_v4  ;;  %3709 = vmatprep.subr.bf16.mxu0 (!%p5884_p5), %v4895_v1  ;;  %v4193_v22 = vld [vmem:[#allocation8 + $0x8] sm:$0xff] (!%p5884_p5)   ;;  %v4195_v24 = vld [vmem:[#allocation8 + $0x10] sm:$0xff] (!%p5884_p5)   ;;  %v4196_v25 = vld [vmem:[#allocation6 + $0x18] sm:$0xff] (!%p5884_p5)   ;;  %s5887_s23 = smov (!%p5884_p5), %s5886_s0 }
 0x210   : > { %3729 = vmatprep.subr.bf16.mxu1 %v4895_v1  ;;  %v4197_v26 = vld [vmem:[#allocation8 + $0x18] sm:$0xff]   ;;  %v4198_v27 = vld [vmem:[#allocation6 + $0x20] sm:$0xff]   ;;  %v4200_v29 = vld [vmem:[#allocation6 + $0x28] sm:$0xff]  }
 0x211   : > { %v4199_v28 = vld [vmem:[#allocation8 + $0x20] sm:$0xff]   ;;  %v4201_v30 = vld [vmem:[#allocation8 + $0x28] sm:$0xff]   ;;  %v4202_v31 = vld [vmem:[#allocation6 + $0x30] sm:$0xff]  }
 0x212   : > { %3710 = vmatpush3.bf16.msra.mxu0 %v4178_v5  ;;  %v4203_v32 = vld [vmem:[#allocation8 + $0x30] sm:$0xff]   ;;  %v4204_v33 = vld [vmem:[#allocation6 + $0x38] sm:$0xff]   ;;  %v4206_v36 = vld [vmem:[#allocation9] sm:$0xff]  }
 0x213   : > { %3730 = vmatpush3.bf16.msra.mxu1 %v4179_v6  ;;  %3711 = vmatprep.subr.bf16.mxu0 %v4895_v1  ;;  %v4205_v34 = vld [vmem:[#allocation8 + $0x38] sm:$0xff]   ;;  %v832_v35 = vld [vmem:[%s5885_s3] sm:$0xf]  ;;  %v4207_v37 = vld [vmem:[#allocation14] sm:$0xff]  }
 0x214   : > { %3731 = vmatprep.subr.bf16.mxu1 %v4895_v1  ;;  %v4208_v38 = vld [vmem:[#allocation9 + $0x8] sm:$0xff]   ;;  %v4210_v40 = vld [vmem:[#allocation9 + $0x10] sm:$0xff]   ;;  %v4212_v42 = vld [vmem:[#allocation9 + $0x18] sm:$0xff]  }
 0x215   : > { %v4209_v39 = vld [vmem:[#allocation14 + $0x8] sm:$0xff]   ;;  %v4211_v41 = vld [vmem:[#allocation14 + $0x10] sm:$0xff]   ;;  %v4213_v43 = vld [vmem:[#allocation14 + $0x18] sm:$0xff]  }
 0x216   : > { %3712 = vmatpush3.bf16.msra.mxu0 %v4180_v7  ;;  %v4214_v44 = vld [vmem:[#allocation9 + $0x20] sm:$0xff]   ;;  %v4216_v46 = vld [vmem:[#allocation9 + $0x28] sm:$0xff]   ;;  %v4218_v48 = vld [vmem:[#allocation9 + $0x30] sm:$0xff]  }
 0x217   : > { %3732 = vmatpush3.bf16.msra.mxu1 %v4181_v8  ;;  %3713 = vmatprep.subr.bf16.mxu0 %v4895_v1  ;;  %v4215_v45 = vld [vmem:[#allocation14 + $0x20] sm:$0xff]   ;;  %v4217_v47 = vld [vmem:[#allocation14 + $0x28] sm:$0xff]   ;;  %v4219_v49 = vld [vmem:[#allocation14 + $0x30] sm:$0xff]  }
 0x218   : > { %3733 = vmatprep.subr.bf16.mxu1 %v4895_v1  ;;  %v4220_v50 = vld [vmem:[#allocation9 + $0x38] sm:$0xff]   ;;  %v3520_v63 = vld [vmem:[#allocation15] ss:$0 sm:$0xff] }
 0x219   : > { %v4221_v51 = vld [vmem:[#allocation14 + $0x38] sm:$0xff]  }
 0x21a   : > { %3714 = vmatpush3.bf16.msra.mxu0 %v4182_v9  ;;  %v5561_v52 = vld [vmem:[%s5886_s0] sm:$0xff]  ;;  %v5566_v53 = vld [vmem:[%s5887_s23 + $0x8] sm:$0xff] }
 0x21b   : > { %3734 = vmatpush3.bf16.msra.mxu1 %v4183_v10  ;;  %3715 = vmatprep.subr.bf16.mxu0 %v4895_v1 }
 0x21c   : > { %3735 = vmatprep.subr.bf16.mxu1 %v4895_v1 }
 0x21e   : > { %3716 = vmatpush3.bf16.msra.mxu0 %v4184_v11 }
 0x21f   : > { %3736 = vmatpush3.bf16.msra.mxu1 %v4185_v12  ;;  %3717 = vmatprep.subr.bf16.mxu0 %v4895_v1  ;;  %v3530_v12 = vld [vmem:[#allocation17] ss:$0 sm:$0xff] }
 0x220   : > { %3737 = vmatprep.subr.bf16.mxu1 %v4895_v1 }
 0x222   : > { %3718 = vmatpush3.bf16.msra.mxu0 %v4186_v13 }
 0x223   : > { %3738 = vmatpush3.bf16.msra.mxu1 %v4187_v14  ;;  %3719 = vmatprep.subr.bf16.mxu0 %v4895_v1 }
 0x224   : > { %3739 = vmatprep.subr.bf16.mxu1 %v4895_v1 }
 0x226   : > { %3720 = vmatpush3.bf16.msra.mxu0 %v4188_v15 }
 0x227   : > { %3740 = vmatpush3.bf16.msra.mxu1 %v4189_v17  ;;  %3745 = vmatprep.subr.bf16.mxu0 %v4895_v1 }
 0x228   : > { %3765 = vmatprep.subr.bf16.mxu1 %v4895_v1 }
 0x229   : > { %3722 = vmatmul.mubr.bf16.vlgmr.msra.gmra.mrb[0].mxu0 %v5504_v18 }
 0x22a   : > { %3742 = vmatmul.mubr.bf16.vlgmr.msra.gmra.mrb[0].mxu1 %v5504_v18  ;;  %3746 = vmatpush3.bf16.msra.mxu0 %v4190_v19  ;;  %v3532_v19 = vld [vmem:[#allocation18] ss:$0 sm:$0xff] }
 0x22b   : > { %3766 = vmatpush3.bf16.msra.mxu1 %v4191_v20  ;;  %3747 = vmatprep.subr.bf16.mxu0 %v4895_v1  ;;  %v3541_v20 = vld [vmem:[#allocation20] ss:$0 sm:$0xff] }
 0x22c   : > { %3767 = vmatprep.subr.bf16.mxu1 %v4895_v1  ;;  %3761 = vmatprep.mubr.msk.bf16.mxu0 %vm4896_vm0, %v4895_v1 }
 0x22d   : > { %3781 = vmatprep.mubr.msk.bf16.mxu1 %vm4896_vm0, %v4895_v1 }
 0x22e   : > { %3748 = vmatpush3.bf16.msra.mxu0 %v4192_v21 }
 0x22f   : > { %3768 = vmatpush3.bf16.msra.mxu1 %v4193_v22  ;;  %3749 = vmatprep.subr.bf16.mxu0 %v4895_v1 }
 0x230   : > { %3769 = vmatprep.subr.bf16.mxu1 %v4895_v1 }
 0x232   : > { %3750 = vmatpush3.bf16.msra.mxu0 %v4194_v23 }
 0x233   : > { %3770 = vmatpush3.bf16.msra.mxu1 %v4195_v24  ;;  %3751 = vmatprep.subr.bf16.mxu0 %v4895_v1 }
 0x234   : > { %3771 = vmatprep.subr.bf16.mxu1 %v4895_v1 }
 0x236   : > { %3752 = vmatpush3.bf16.msra.mxu0 %v4196_v25 }
 0x237   : > { %3772 = vmatpush3.bf16.msra.mxu1 %v4197_v26  ;;  %3753 = vmatprep.subr.bf16.mxu0 %v4895_v1 }
 0x238   : > { %3773 = vmatprep.subr.bf16.mxu1 %v4895_v1 }
 0x23a   : > { %3754 = vmatpush3.bf16.msra.mxu0 %v4198_v27 }
 0x23b   : > { %3774 = vmatpush3.bf16.msra.mxu1 %v4199_v28  ;;  %3755 = vmatprep.subr.bf16.mxu0 %v4895_v1 }
 0x23c   : > { %3775 = vmatprep.subr.bf16.mxu1 %v4895_v1 }
 0x23e   : > { %3756 = vmatpush3.bf16.msra.mxu0 %v4200_v29 }
 0x23f   : > { %3776 = vmatpush3.bf16.msra.mxu1 %v4201_v30  ;;  %3757 = vmatprep.subr.bf16.mxu0 %v4895_v1 }
 0x240   : > { %3777 = vmatprep.subr.bf16.mxu1 %v4895_v1 }
 0x242   : > { %3758 = vmatpush3.bf16.msra.mxu0 %v4202_v31 }
 0x243   : > { %3778 = vmatpush3.bf16.msra.mxu1 %v4203_v32  ;;  %3759 = vmatprep.subr.bf16.mxu0 %v4895_v1 }
 0x244   : > { %3779 = vmatprep.subr.bf16.mxu1 %v4895_v1 }
 0x246   : > { %3760 = vmatpush3.bf16.msra.mxu0 %v4204_v33 }
 0x247   : > { %3780 = vmatpush3.bf16.msra.mxu1 %v4205_v34  ;;  %3785 = vmatprep.subr.bf16.mxu0 %v4895_v1 }
 0x248   : > { %3805 = vmatprep.subr.bf16.mxu1 %v4895_v1 }
 0x249   : > { %3762 = vmatmul.mubr.bf16.vlgmr.msra.gmra.mrb[4].mxu0 %v832_v35 }
 0x24a   : > { %3782 = vmatmul.mubr.bf16.vlgmr.msra.gmra.mrb[4].mxu1 %v832_v35  ;;  %3786 = vmatpush3.bf16.msra.mxu0 %v4206_v36 }
 0x24b   : > { %3806 = vmatpush3.bf16.msra.mxu1 %v4207_v37  ;;  %3787 = vmatprep.subr.bf16.mxu0 %v4895_v1  ;;  %v1522_v37 = vlaneseq }
 0x24c   : > { %3807 = vmatprep.subr.bf16.mxu1 %v4895_v1  ;;  %3801 = vmatprep.mubr.msk.bf16.mxu0 %vm4896_vm0, %v4895_v1 }
 0x24d   : > { %3821 = vmatprep.mubr.msk.bf16.mxu1 %vm4896_vm0, %v4895_v1 }
 0x24e   : > { %3788 = vmatpush3.bf16.msra.mxu0 %v4208_v38 }
 0x24f   : > { %3808 = vmatpush3.bf16.msra.mxu1 %v4209_v39  ;;  %3789 = vmatprep.subr.bf16.mxu0 %v4895_v1 }
 0x250   : > { %3809 = vmatprep.subr.bf16.mxu1 %v4895_v1 }
 0x252   : > { %3790 = vmatpush3.bf16.msra.mxu0 %v4210_v40  ;;  %v1523_v40 = vshrl.u32 %v1522_v37, 7 }
 0x253   : > { %3810 = vmatpush3.bf16.msra.mxu1 %v4211_v41  ;;  %3791 = vmatprep.subr.bf16.mxu0 %v4895_v1 }
 0x254   : > { %3811 = vmatprep.subr.bf16.mxu1 %v4895_v1 }
 0x256   : > { %3792 = vmatpush3.bf16.msra.mxu0 %v4212_v42 }
 0x257   : > { %3812 = vmatpush3.bf16.msra.mxu1 %v4213_v43  ;;  %3793 = vmatprep.subr.bf16.mxu0 %v4895_v1 }
 0x258   : > { %3813 = vmatprep.subr.bf16.mxu1 %v4895_v1 }
 0x25a   : > { %3794 = vmatpush3.bf16.msra.mxu0 %v4214_v44 }
 0x25b   : > { %3814 = vmatpush3.bf16.msra.mxu1 %v4215_v45  ;;  %3795 = vmatprep.subr.bf16.mxu0 %v4895_v1 }
 0x25c   : > { %3815 = vmatprep.subr.bf16.mxu1 %v4895_v1 }
 0x25e   : > { %3796 = vmatpush3.bf16.msra.mxu0 %v4216_v46 }
 0x25f   : > { %3816 = vmatpush3.bf16.msra.mxu1 %v4217_v47  ;;  %3797 = vmatprep.subr.bf16.mxu0 %v4895_v1 }
 0x260   : > { %3817 = vmatprep.subr.bf16.mxu1 %v4895_v1 }
 0x262   : > { %3798 = vmatpush3.bf16.msra.mxu0 %v4218_v48 }
 0x263   : > { %3818 = vmatpush3.bf16.msra.mxu1 %v4219_v49  ;;  %3799 = vmatprep.subr.bf16.mxu0 %v4895_v1 }
 0x264   : > { %3819 = vmatprep.subr.bf16.mxu1 %v4895_v1 }
 0x266   : > { %3800 = vmatpush3.bf16.msra.mxu0 %v4220_v50  ;;  %v5582_v50 = vld [vmem:[%s5887_s23 + $0x10] sm:$0xff] }
 0x267   : > { %3820 = vmatpush3.bf16.msra.mxu1 %v4221_v51  ;;  %3825 = vmatprep.subr.mxu0 %v4895_v1 }
 0x268   : > { %3830 = vmatprep.subr.mxu1 %v4895_v1 }
 0x269   : > { %3802 = vmatmul.mubr.bf16.vlgmr.msra.gmra.mrb[8].mxu0 %v832_v35  ;;  %v4897_v35 = vmov 1966171168  }
 0x26a   : > { %3822 = vmatmul.mubr.bf16.vlgmr.msra.gmra.mrb[8].mxu1 %v5504_v18  ;;  %3827 = vmatprep.mubr.msk.f32.mxu0 %vm4896_vm0, %v4895_v1  ;;  %v1520_v36 = vunpack.c.l.s4 %v4897_v35 }
 0x26b   : > { %3832 = vmatprep.mubr.msk.f32.mxu1 %vm4896_vm0, %v4895_v1 }
 0x26c   : > { %v1521_v39 = vunpack.c.0.s8 %v1520_v36 }
 0x26e   : > { %v1524_v45 = vsub.s32 %v1521_v39, %v1523_v40 }
 0x26f   : > { %3826 = vmatpush3.xpose.msra.mxu0 %v5561_v52 }
 0x270   : > { %3831 = vmatpush3.xpose.msra.mxu1 %v5566_v53  ;;  %3835 = vmatprep.subr.mxu0 %v4895_v1 }
 0x271   : > { %3840 = vmatprep.subr.mxu1 %v4895_v1 }
 0x2fc   : > { %v981_v54 = vpop.f32.mrb[0].mxu0 }
 0x2fd   : > { %v1085_v55 = vpop.f32.mrb[0].mxu1  ;;  %v3723_v56 = vpop.f32.mrb[1].mxu0 }
 0x2fe   : > { %v3743_v57 = vpop.f32.mrb[1].mxu1  ;;  %v984_v58 = vpop.f32.mrb[2].mxu0 }
 0x2ff   : > { %v1088_v59 = vpop.f32.mrb[2].mxu1  ;;  %v3724_v60 = vpop.f32.mrb[3].mxu0  ;;  %v5596_v57 = vld [vmem:[%s5887_s23 + $0x20] sm:$0xff] }
 0x300   : > { %v3744_v61 = vpop.f32.mrb[3].mxu1  ;;  %v5605_v59 = vld [vmem:[%s5887_s23 + $0x28] sm:$0xff] }
 0x31c   : > { %v1189_v62 = vpop.f32.mrb[4].mxu0 }
 0x31d   : > { %v1190_v0 = vadd.f32 %v1189_v62, %v981_v54  ;;  %v1291_v2 = vpop.f32.mrb[4].mxu1  ;;  %v3763_v3 = vpop.f32.mrb[5].mxu0  ;;  %v5587_v54 = vld [vmem:[%s5887_s23 + $0x18] sm:$0xff]  ;;  %v5614_v62 = vld [vmem:[%s5887_s23 + $0x30] sm:$0xff] }
 0x31e   : > { %v1292_v4 = vadd.f32 %v1291_v2, %v1085_v55  ;;  %v3783_v5 = vpop.f32.mrb[5].mxu1  ;;  %v1192_v6 = vpop.f32.mrb[6].mxu0 }
 0x31f   : > { %v1202_v7 = vadd.f32 %v3520_v63, %v1190_v0  ;;  %v1294_v8 = vpop.f32.mrb[6].mxu1  ;;  %v3764_v9 = vpop.f32.mrb[7].mxu0  ;;  %v5623_v0 = vld [vmem:[%s5887_s23 + $0x38] sm:$0xff] }
 0x320   : > { %v3784_v10 = vpop.f32.mrb[7].mxu1  ;;  %v1304_v13 = vadd.f32 %v3530_v12, %v1292_v4 }
 0x321   : > { %v3521_v11 = vmul.f32 -1.442695, %v1202_v7 }
 0x322   : > { %v3531_v14 = vmul.f32 -1.442695, %v1304_v13 }
 0x323   : > { %4238 = vpow2.f32 %v3521_v11 }
 0x324   : > { %4240 = vpow2.f32 %v3531_v14 }
 0x32d   : > { %v4239_v15 = vpop.eup %4238 }
 0x32e   : > { %v1206_v17 = vadd.f32 1.0, %v4239_v15  ;;  %v4241_v18 = vpop.eup %4240 }
 0x32f   : > { %v1308_v21 = vadd.f32 1.0, %v4241_v18 }
 0x330   : > { %4242 = vrcp.f32 %v1206_v17 }
 0x331   : > { %4244 = vrcp.f32 %v1308_v21 }
 0x33a   : > { %v4243_v29 = vpop.eup %4242 }
 0x33b   : > { %v4245_v38 = vpop.eup %4244 }
 0x33c   : > { %v1400_v22 = vpop.f32.mrb[8].mxu0  ;;  %v1504_v41 = vsub.f32 1.0, %v4245_v38  ;;  %v1506_v43 = vmul.f32 %v4245_v38, %v5498_v16 }
 0x33d   : > { %v1495_v23 = vpop.f32.mrb[8].mxu1  ;;  %v3803_v24 = vpop.f32.mrb[9].mxu0  ;;  %v1401_v25 = vadd.f32 %v3532_v19, %v1400_v22 }
 0x33e   : > { %v1496_v26 = vadd.f32 %v3541_v20, %v1495_v23  ;;  %v3823_v27 = vpop.f32.mrb[9].mxu1  ;;  %v1403_v28 = vpop.f32.mrb[10].mxu0 }
 0x33f   : > { %v1498_v30 = vpop.f32.mrb[10].mxu1  ;;  %v3804_v31 = vpop.f32.mrb[11].mxu0 }
 0x340   : > { %v1501_v32 = vmul.f32 %v4243_v29, %v1496_v26  ;;  %v3824_v33 = vpop.f32.mrb[11].mxu1 }
 0x342   : > { %v1502_v34 = vadd.f32 %v1501_v32, %v1401_v25 }
 0x344   : > { %4246 = vtanh.f32 %v1502_v34 }
 0x34e   : > { %v4247_v42 = vpop.eup %4246 }
 0x34f   : > { %v1505_v44 = vmul.f32 %v4247_v42, %v1504_v41 }
 0x351   : > { %v5573_v46 = vadd.f32 %v1506_v43, %v1505_v44 }
 0x353   : > { %1508 = vst [vmem:[#allocation29] sm:$0xff] %v5573_v46  ;;  %v1525_v47 = vrot.slane %v5573_v46, %v1524_v45  ;;  %v1518_v48 = vcombine.high %v5573_v46, %v5573_v46 }
 0x355   : > { %v1541_v49 = vrot.slane %v1525_v47, %v1524_v45  ;;  %v1533_v51 = vcombine.high %v1525_v47, %v1525_v47  ;;  %v1532_v55 = vrot.slane %v1518_v48, %v1524_v45 }
 0x357   : > { %3828 = vmatmul.mubr.f32.vlgmr.msra.gmra.mrb[12].mxu0 %v1541_v49  ;;  %v1555_v16 = vrot.slane %v1533_v51, %v1524_v45  ;;  %v1563_v56 = vcombine.high %v1541_v49, %v1541_v49  ;;  %v1534_v60 = vcombine.high %v1532_v55, %v1532_v55  ;;  %v1548_v61 = vrot.slane %v1532_v55, %v1524_v45 }
 0x358   : > { %3836 = vmatpush3.xpose.msra.mxu0 %v5582_v50  ;;  %3837 = vmatprep.mubr.msk.f32.mxu0 %vm4896_vm0, %v4895_v1 }
 0x359   : > { %3833 = vmatmul.mubr.f32.vlgmr.msra.gmra.mrb[12].mxu1 %v1555_v16  ;;  %3845 = vmatprep.subr.mxu0 %v4895_v1  ;;  %v1565_v58 = vcombine.high %v1555_v16, %v1555_v16  ;;  %v1562_v63 = vrot.slane %v1534_v60, %v1524_v45  ;;  %v1564_v2 = vcombine.high %v1548_v61, %v1548_v61 }
 0x35a   : > { %3841 = vmatpush3.xpose.msra.mxu1 %v5587_v54  ;;  %3842 = vmatprep.mubr.msk.f32.mxu1 %vm4896_vm0, %v4895_v1 }
 0x35b   : > { %3838 = vmatmul.mubr.f32.vlgmr.msra.gmra.mrb[14].mxu0 %v1563_v56  ;;  %3850 = vmatprep.subr.mxu1 %v4895_v1  ;;  %v1566_v3 = vcombine.high %v1562_v63, %v1562_v63 }
 0x35c   : > { %3846 = vmatpush3.xpose.msra.mxu0 %v5596_v57  ;;  %3847 = vmatprep.mubr.msk.f32.mxu0 %vm4896_vm0, %v4895_v1 }
 0x35d   : > { %3843 = vmatmul.mubr.f32.vlgmr.msra.gmra.mrb[14].mxu1 %v1565_v58  ;;  %3855 = vmatprep.subr.mxu0 %v4895_v1 }
 0x35e   : > { %3851 = vmatpush3.xpose.msra.mxu1 %v5605_v59  ;;  %3852 = vmatprep.mubr.msk.f32.mxu1 %vm4896_vm0, %v4895_v1 }
 0x35f   : > { %3848 = vmatmul.mubr.f32.vlgmr.msra.gmra.mrb[16].mxu0 %v1548_v61  ;;  %3860 = vmatprep.subr.mxu1 %v4895_v1 }
 0x360   : > { %3856 = vmatpush3.xpose.msra.mxu0 %v5614_v62  ;;  %3857 = vmatprep.mubr.msk.f32.mxu0 %vm4896_vm0, %v4895_v1 }
 0x361   : > { %3853 = vmatmul.mubr.f32.vlgmr.msra.gmra.mrb[16].mxu1 %v1562_v63  ;;  %3865 = vmatprep.subr.mxu0 %v4895_v1 }
 0x362   : > { %3861 = vmatpush3.xpose.msra.mxu1 %v5623_v0  ;;  %3862 = vmatprep.mubr.msk.f32.mxu1 %vm4896_vm0, %v4895_v1 }
 0x363   : > { %3858 = vmatmul.mubr.f32.vlgmr.msra.gmra.mrb[18].mxu0 %v1564_v2  ;;  %3870 = vmatprep.subr.mxu1 %v4895_v1 }
 0x364   : > { %3866 = vmatpush3.msra.mxu0 %v5561_v52  ;;  %3867 = vmatprep.mubr.msk.f32.mxu0 %vm4896_vm0, %v4895_v1 }
 0x365   : > { %3863 = vmatmul.mubr.f32.vlgmr.msra.gmra.mrb[18].mxu1 %v1566_v3  ;;  %3875 = vmatprep.subr.mxu0 %v4895_v1 }
 0x366   : > { %3871 = vmatpush3.msra.mxu1 %v5566_v53  ;;  %3872 = vmatprep.mubr.msk.f32.mxu1 %vm4896_vm0, %v4895_v1 }
 0x367   : > { %3880 = vmatprep.subr.mxu1 %v4895_v1 }
 0x42a   : > { %v1641_v4 = vpop.f32.mrb[12].mxu0 }
 0x42b   : > { %v3829_v5 = vpop.f32.mrb[13].mxu0  ;;  %v2136_v6 = vsel %vm2135_vm1, %v1641_v4, -inf }
 0x42c   : > { %v1711_v7 = vpop.f32.mrb[12].mxu1  ;;  %2137 = vmax.xlane.f32.xlu0 %v2136_v6 }
 0x42d   : > { %v3834_v52 = vpop.f32.mrb[13].mxu1  ;;  %v2139_v10 = vsel %vm2135_vm1, %v1711_v7, -inf }
 0x42e   : > { %v1781_v8 = vpop.f32.mrb[14].mxu0 }
 0x42f   : > { %v3839_v9 = vpop.f32.mrb[15].mxu0  ;;  %v2142_v11 = vsel %vm2135_vm1, %v1781_v8, -inf }
 0x430   : > { %v1851_v53 = vpop.f32.mrb[14].mxu1  ;;  %2140 = vmax.xlane.f32.xlu0 %v2139_v10  ;;  %2143 = vmax.xlane.f32.xlu1 %v2142_v11 }
 0x431   : > { %v3844_v12 = vpop.f32.mrb[15].mxu1  ;;  %v2145_v15 = vsel %vm2135_vm1, %v1851_v53, -inf }
 0x432   : > { %v1921_v13 = vpop.f32.mrb[16].mxu0 }
 0x433   : > { %v3849_v14 = vpop.f32.mrb[17].mxu0  ;;  %v2148_v17 = vsel %vm2135_vm1, %v1921_v13, -inf }
 0x434   : > { %v1991_v18 = vpop.f32.mrb[16].mxu1  ;;  %2146 = vmax.xlane.f32.xlu1 %v2145_v15  ;;  %2149 = vmax.xlane.f32.xlu0 %v2148_v17 }
 0x435   : > { %v3854_v19 = vpop.f32.mrb[17].mxu1  ;;  %v2151_v22 = vsel %vm2135_vm1, %v1991_v18, -inf }
 0x436   : > { %v2061_v20 = vpop.f32.mrb[18].mxu0 }
 0x437   : > { %v3859_v21 = vpop.f32.mrb[19].mxu0  ;;  %v2154_v23 = vsel %vm2135_vm1, %v2061_v20, -inf }
 0x438   : > { %v2131_v24 = vpop.f32.mrb[18].mxu1  ;;  %2152 = vmax.xlane.f32.xlu1 %v2151_v22  ;;  %2155 = vmax.xlane.f32.xlu0 %v2154_v23 }
 0x439   : > { %v3864_v25 = vpop.f32.mrb[19].mxu1  ;;  %v2157_v26 = vsel %vm2135_vm1, %v2131_v24, -inf }
 0x43c   : > { %2158 = vmax.xlane.f32.xlu1 %v2157_v26 }
 0x4b9   : > { %v2138_v27 = vpop.xlane.xlu0 %2137 }
 0x4ba   : > { %v2160_v28 = vsub.f32 %v1641_v4, %v2138_v27 }
 0x4bc   : > { %v2168_v29 = vmul.f32 1.442695, %v2160_v28 }
 0x4bd   : > { %v2141_v30 = vpop.xlane.xlu0 %2140  ;;  %v2144_v31 = vpop.xlane.xlu1 %2143 }
 0x4be   : > { %4248 = vpow2.f32 %v2168_v29  ;;  %v2161_v32 = vsub.f32 %v1711_v7, %v2141_v30  ;;  %v2162_v33 = vsub.f32 %v1781_v8, %v2144_v31  ;;  %v4230_v30 = vld [vmem:[#allocation23] sm:$0xff]  }
 0x4c0   : > { %v2170_v34 = vmul.f32 1.442695, %v2161_v32  ;;  %v2172_v35 = vmul.f32 1.442695, %v2162_v33  ;;  %v4223_v33 = vld [vmem:[#allocation21 + $0x8] sm:$0xff]  }
 0x4c1   : > { %v2147_v36 = vpop.xlane.xlu1 %2146  ;;  %v2150_v37 = vpop.xlane.xlu0 %2149 }
 0x4c2   : > { %4250 = vpow2.f32 %v2170_v34  ;;  %v2163_v38 = vsub.f32 %v1851_v53, %v2147_v36  ;;  %v2164_v39 = vsub.f32 %v1921_v13, %v2150_v37  ;;  %v4225_v34 = vld [vmem:[#allocation21 + $0x18] sm:$0xff]   ;;  %v4227_v36 = vld [vmem:[#allocation21 + $0x28] sm:$0xff]   ;;  %v4228_v37 = vld [vmem:[#allocation21 + $0x30] sm:$0xff]  }
 0x4c3   : > { %4252 = vpow2.f32 %v2172_v35  ;;  %v4226_v35 = vld [vmem:[#allocation21 + $0x20] sm:$0xff]  }
 0x4c4   : > { %v2174_v40 = vmul.f32 1.442695, %v2163_v38  ;;  %v2176_v41 = vmul.f32 1.442695, %v2164_v39  ;;  %v4229_v38 = vld [vmem:[#allocation21 + $0x38] sm:$0xff]   ;;  %v2817_v39 = vpack.c.bf16 %v5573_v46, %v5573_v46 }
 0x4c5   : > { %v2153_v42 = vpop.xlane.xlu1 %2152  ;;  %v2156_v43 = vpop.xlane.xlu0 %2155  ;;  %v4237_v46 = vld [vmem:[#allocation23 + $0x38] sm:$0xff]  }
 0x4c6   : > { %4254 = vpow2.f32 %v2174_v40  ;;  %v2165_v44 = vsub.f32 %v1991_v18, %v2153_v42  ;;  %v2166_v45 = vsub.f32 %v2061_v20, %v2156_v43  ;;  %v4232_v40 = vld [vmem:[#allocation23 + $0x10] sm:$0xff]   ;;  %v4234_v42 = vld [vmem:[#allocation23 + $0x20] sm:$0xff]   ;;  %v4235_v43 = vld [vmem:[#allocation23 + $0x28] sm:$0xff]  }
 0x4c7   : > { %4256 = vpow2.f32 %v2176_v41  ;;  %v4233_v41 = vld [vmem:[#allocation23 + $0x18] sm:$0xff]  }
 0x4c8   : > { %v4249_v47 = vpop.eup %4248  ;;  %v2178_v48 = vmul.f32 1.442695, %v2165_v44  ;;  %v2180_v49 = vmul.f32 1.442695, %v2166_v45  ;;  %v4236_v44 = vld [vmem:[#allocation23 + $0x30] sm:$0xff]  }
 0x4c9   : > { %v2159_v51 = vpop.xlane.xlu1 %2158  ;;  %v2184_v16 = vsel %vm2135_vm1, %v4249_v47, 0.0 }
 0x4ca   : > { %4258 = vpow2.f32 %v2178_v48  ;;  %v2167_v55 = vsub.f32 %v2131_v24, %v2159_v51  ;;  %2185 = vadd.xlane.f32.xlu0 %v2184_v16 }
 0x4cb   : > { %4260 = vpow2.f32 %v2180_v49 }
 0x4cc   : > { %v4251_v56 = vpop.eup %4250  ;;  %v2182_v58 = vmul.f32 1.442695, %v2167_v55 }
 0x4cd   : > { %v4253_v60 = vpop.eup %4252  ;;  %v2187_v61 = vsel %vm2135_vm1, %v4251_v56, 0.0 }
 0x4ce   : > { %4262 = vpow2.f32 %v2182_v58  ;;  %2188 = vadd.xlane.f32.xlu1 %v2187_v61  ;;  %v2190_v63 = vsel %vm2135_vm1, %v4253_v60, 0.0 }
 0x4cf   : > { %2191 = vadd.xlane.f32.xlu0 %v2190_v63 }
 0x4d0   : > { %v4255_v2 = vpop.eup %4254 }
 0x4d1   : > { %v4257_v3 = vpop.eup %4256  ;;  %v2193_v4 = vsel %vm2135_vm1, %v4255_v2, 0.0 }
 0x4d2   : > { %2194 = vadd.xlane.f32.xlu1 %v2193_v4  ;;  %v2196_v5 = vsel %vm2135_vm1, %v4257_v3, 0.0 }
 0x4d3   : > { %2197 = vadd.xlane.f32.xlu0 %v2196_v5 }
 0x4d4   : > { %v4259_v6 = vpop.eup %4258 }
 0x4d5   : > { %v4261_v7 = vpop.eup %4260  ;;  %v2199_v52 = vsel %vm2135_vm1, %v4259_v6, 0.0 }
 0x4d6   : > { %2200 = vadd.xlane.f32.xlu1 %v2199_v52  ;;  %v2202_v8 = vsel %vm2135_vm1, %v4261_v7, 0.0 }
 0x4d7   : > { %2203 = vadd.xlane.f32.xlu0 %v2202_v8 }
 0x4d8   : > { %v4263_v9 = vpop.eup %4262 }
 0x4d9   : > { %v2205_v10 = vsel %vm2135_vm1, %v4263_v9, 0.0 }
 0x4da   : > { %2206 = vadd.xlane.f32.xlu1 %v2205_v10 }
 0x557   : > { %v2186_v11 = vpop.xlane.xlu0 %2185 }
 0x558   : > { %4264 = vrcp.f32 %v2186_v11 }
 0x55b   : > { %v2189_v53 = vpop.xlane.xlu1 %2188 }
 0x55c   : > { %4266 = vrcp.f32 %v2189_v53  ;;  %v2192_v12 = vpop.xlane.xlu0 %2191 }
 0x55d   : > { %4268 = vrcp.f32 %v2192_v12 }
 0x55f   : > { %v2195_v13 = vpop.xlane.xlu1 %2194 }
 0x560   : > { %4270 = vrcp.f32 %v2195_v13  ;;  %v2198_v14 = vpop.xlane.xlu0 %2197 }
 0x561   : > { %4272 = vrcp.f32 %v2198_v14 }
 0x562   : > { %v4265_v15 = vpop.eup %4264 }
 0x563   : > { %v2216_v17 = vmul.f32 %v4265_v15, %v4249_v47  ;;  %v2201_v18 = vpop.xlane.xlu1 %2200 }
 0x564   : > { %4274 = vrcp.f32 %v2201_v18  ;;  %v2204_v19 = vpop.xlane.xlu0 %2203 }
 0x565   : > { %4276 = vrcp.f32 %v2204_v19  ;;  %3868 = vmatmul.mubr.msk.f32.vlgmr.msra.gmra.mrb[20].mxu0 %vm2224_vm2, %v2216_v17 }
 0x566   : > { %v4267_v20 = vpop.eup %4266  ;;  %3876 = vmatpush3.msra.mxu0 %v5582_v50  ;;  %3877 = vmatprep.mubr.msk.f32.mxu0 %vm4896_vm0, %v4895_v1 }
 0x567   : > { %v4269_v21 = vpop.eup %4268  ;;  %v2217_v22 = vmul.f32 %v4267_v20, %v4251_v56  ;;  %v2207_v23 = vpop.xlane.xlu1 %2206  ;;  %3885 = vmatprep.subr.mxu0 %v4895_v1 }
 0x568   : > { %v2218_v24 = vmul.f32 %v4269_v21, %v4253_v60  ;;  %4278 = vrcp.f32 %v2207_v23 }
 0x569   : > { %3873 = vmatmul.mubr.msk.f32.vlgmr.msra.gmra.mrb[20].mxu1 %vm2224_vm2, %v2217_v22 }
 0x56a   : > { %v4271_v25 = vpop.eup %4270  ;;  %3878 = vmatmul.mubr.msk.f32.vlgmr.msra.gmra.mrb[22].mxu0 %vm2224_vm2, %v2218_v24  ;;  %3881 = vmatpush3.msra.mxu1 %v5587_v54 }
 0x56b   : > { %v4273_v26 = vpop.eup %4272  ;;  %v2219_v27 = vmul.f32 %v4271_v25, %v4255_v2  ;;  %3882 = vmatprep.mubr.msk.f32.mxu1 %vm4896_vm0, %v4895_v1  ;;  %3886 = vmatpush3.msra.mxu0 %v5596_v57 }
 0x56c   : > { %v2220_v50 = vmul.f32 %v4273_v26, %v4257_v3  ;;  %3887 = vmatprep.mubr.msk.f32.mxu0 %vm4896_vm0, %v4895_v1  ;;  %3890 = vmatprep.subr.mxu1 %v4895_v1 }
 0x56d   : > { %3883 = vmatmul.mubr.msk.f32.vlgmr.msra.gmra.mrb[22].mxu1 %vm2224_vm2, %v2219_v27  ;;  %3895 = vmatprep.subr.mxu0 %v4895_v1 }
 0x56e   : > { %v4275_v28 = vpop.eup %4274  ;;  %3888 = vmatmul.mubr.msk.f32.vlgmr.msra.gmra.mrb[24].mxu0 %vm2224_vm2, %v2220_v50  ;;  %3891 = vmatpush3.msra.mxu1 %v5605_v59  ;;  %v4222_v59 = vld [vmem:[#allocation21] sm:$0xff]  }
 0x56f   : > { %v4277_v54 = vpop.eup %4276  ;;  %v2221_v29 = vmul.f32 %v4275_v28, %v4259_v6  ;;  %3892 = vmatprep.mubr.msk.f32.mxu1 %vm4896_vm0, %v4895_v1  ;;  %3896 = vmatpush3.msra.mxu0 %v5614_v62  ;;  %v4231_v62 = vld [vmem:[#allocation23 + $0x8] sm:$0xff]  }
 0x570   : > { %v2222_v57 = vmul.f32 %v4277_v54, %v4261_v7  ;;  %3897 = vmatprep.mubr.msk.f32.mxu0 %vm4896_vm0, %v4895_v1  ;;  %3900 = vmatprep.subr.mxu1 %v4895_v1 }
 0x571   : > { %3893 = vmatmul.mubr.msk.f32.vlgmr.msra.gmra.mrb[24].mxu1 %vm2224_vm2, %v2221_v29  ;;  %3905 = vmatprep.subr.bf16.mxu0 %v4895_v1 }
 0x572   : > { %v4279_v31 = vpop.eup %4278  ;;  %3898 = vmatmul.mubr.msk.f32.vlgmr.msra.gmra.mrb[26].mxu0 %vm2224_vm2, %v2222_v57  ;;  %3901 = vmatpush3.msra.mxu1 %v5623_v0  ;;  %v4224_v0 = vld [vmem:[#allocation21 + $0x10] sm:$0xff]  }
 0x573   : > { %v2223_v32 = vmul.f32 %v4279_v31, %v4263_v9  ;;  %3902 = vmatprep.mubr.msk.f32.mxu1 %vm4896_vm0, %v4895_v1  ;;  %3925 = vmatprep.subr.bf16.mxu1 %v4895_v1 }
 0x574   : > { %3906 = vmatpush3.bf16.msra.mxu0 %v4230_v30  ;;  %3921 = vmatprep.mubr.msk.bf16.mxu0 %vm4896_vm0, %v4895_v1 }
 0x575   : > { %3903 = vmatmul.mubr.msk.f32.vlgmr.msra.gmra.mrb[26].mxu1 %vm2224_vm2, %v2223_v32  ;;  %3907 = vmatprep.subr.bf16.mxu0 %v4895_v1 }
 0x576   : > { %3926 = vmatpush3.bf16.msra.mxu1 %v4222_v59  ;;  %3941 = vmatprep.mubr.msk.bf16.mxu1 %vm4896_vm0, %v4895_v1 }
 0x577   : > { %3927 = vmatprep.subr.bf16.mxu1 %v4895_v1 }
 0x578   : > { %3908 = vmatpush3.bf16.msra.mxu0 %v4231_v62 }
 0x579   : > { %3909 = vmatprep.subr.bf16.mxu0 %v4895_v1 }
 0x57a   : > { %3928 = vmatpush3.bf16.msra.mxu1 %v4223_v33 }
 0x57b   : > { %3929 = vmatprep.subr.bf16.mxu1 %v4895_v1 }
 0x57c   : > { %3910 = vmatpush3.bf16.msra.mxu0 %v4232_v40 }
 0x57d   : > { %3911 = vmatprep.subr.bf16.mxu0 %v4895_v1 }
 0x57e   : > { %3930 = vmatpush3.bf16.msra.mxu1 %v4224_v0 }
 0x57f   : > { %3931 = vmatprep.subr.bf16.mxu1 %v4895_v1 }
 0x580   : > { %3912 = vmatpush3.bf16.msra.mxu0 %v4233_v41 }
 0x581   : > { %3913 = vmatprep.subr.bf16.mxu0 %v4895_v1 }
 0x582   : > { %3932 = vmatpush3.bf16.msra.mxu1 %v4225_v34  ;;  %v3574_v34 = vld [vmem:[#allocation24] ss:$0 sm:$0xff] }
 0x583   : > { %3933 = vmatprep.subr.bf16.mxu1 %v4895_v1 }
 0x584   : > { %3914 = vmatpush3.bf16.msra.mxu0 %v4234_v42 }
 0x585   : > { %3915 = vmatprep.subr.bf16.mxu0 %v4895_v1 }
 0x586   : > { %3934 = vmatpush3.bf16.msra.mxu1 %v4226_v35 }
 0x587   : > { %3935 = vmatprep.subr.bf16.mxu1 %v4895_v1 }
 0x588   : > { %3916 = vmatpush3.bf16.msra.mxu0 %v4235_v43 }
 0x589   : > { %3917 = vmatprep.subr.bf16.mxu0 %v4895_v1 }
 0x58a   : > { %3936 = vmatpush3.bf16.msra.mxu1 %v4227_v36 }
 0x58b   : > { %3937 = vmatprep.subr.bf16.mxu1 %v4895_v1 }
 0x58c   : > { %3918 = vmatpush3.bf16.msra.mxu0 %v4236_v44 }
 0x58d   : > { %3919 = vmatprep.subr.bf16.mxu0 %v4895_v1 }
 0x58e   : > { %3938 = vmatpush3.bf16.msra.mxu1 %v4228_v37 }
 0x58f   : > { %3939 = vmatprep.subr.bf16.mxu1 %v4895_v1 }
 0x590   : > { %3920 = vmatpush3.bf16.msra.mxu0 %v4237_v46 }
 0x592   : > { %3940 = vmatpush3.bf16.msra.mxu1 %v4229_v38 }
 0x595   : > { %3942 = vmatmul.mubr.bf16.vlgmr.msra.gmra.mrb[28].mxu1 %v2817_v39 }
 0x638   : > { %v2294_v45 = vpop.f32.mrb[20].mxu0 }
 0x639   : > { %v3869_v47 = vpop.f32.mrb[21].mxu0  ;;  %v2834_v49 = vpack.c.bf16 %v2294_v45, %v2294_v45 }
 0x63b   : > { %v2866_v2 = vunpack.c.l.b16 %v2834_v49 }
 0x63c   : > { %v2367_v48 = vpop.f32.mrb[20].mxu1 }
 0x63d   : > { %v2835_v51 = vpack.c.bf16 %v2367_v48, %v2367_v48  ;;  %v2440_v16 = vpop.f32.mrb[22].mxu0  ;;  %v3874_v55 = vpop.f32.mrb[21].mxu1 }
 0x63e   : > { %v2836_v56 = vpack.c.bf16 %v2440_v16, %v2440_v16  ;;  %v3879_v58 = vpop.f32.mrb[23].mxu0 }
 0x63f   : > { %v2867_v60 = vunpack.c.l.b16 %v2835_v51 }
 0x640   : > { %v2868_v61 = vunpack.c.l.b16 %v2836_v56  ;;  %v2513_v63 = vpop.f32.mrb[22].mxu1 }
 0x641   : > { %v2874_v3 = vrot.slane %v2867_v60, 7  ;;  %v2837_v4 = vpack.c.bf16 %v2513_v63, %v2513_v63  ;;  %v2586_v1 = vpop.f32.mrb[24].mxu0  ;;  %v3884_v5 = vpop.f32.mrb[23].mxu1 }
 0x642   : > { %v2877_v6 = vrot.slane %v2868_v61, 6  ;;  %v2838_v7 = vpack.c.bf16 %v2586_v1, %v2586_v1  ;;  %v3889_v52 = vpop.f32.mrb[25].mxu0 }
 0x643   : > { %v2876_v8 = vsel %vm2875_vm3, %v2874_v3, %v2866_v2  ;;  %v2869_v9 = vunpack.c.l.b16 %v2837_v4 }
 0x644   : > { %v2879_v10 = vsel %vm2878_vm4, %v2877_v6, %v2876_v8  ;;  %v2870_v11 = vunpack.c.l.b16 %v2838_v7  ;;  %v2659_v53 = vpop.f32.mrb[24].mxu1 }
 0x645   : > { %v2880_v12 = vrot.slane %v2869_v9, 5  ;;  %v2839_v13 = vpack.c.bf16 %v2659_v53, %v2659_v53  ;;  %v2732_v14 = vpop.f32.mrb[26].mxu0  ;;  %v3894_v15 = vpop.f32.mrb[25].mxu1 }
 0x646   : > { %v2883_v17 = vrot.slane %v2870_v11, 4  ;;  %v2840_v18 = vpack.c.bf16 %v2732_v14, %v2732_v14  ;;  %v3899_v19 = vpop.f32.mrb[27].mxu0 }
 0x647   : > { %v2882_v20 = vsel %vm2881_vm5, %v2880_v12, %v2879_v10  ;;  %v2871_v21 = vunpack.c.l.b16 %v2839_v13 }
 0x648   : > { %v2885_v22 = vsel %vm2884_vm6, %v2883_v17, %v2882_v20  ;;  %v2872_v23 = vunpack.c.l.b16 %v2840_v18  ;;  %v2805_v24 = vpop.f32.mrb[26].mxu1 }
 0x649   : > { %v2886_v25 = vrot.slane %v2871_v21, 3  ;;  %v2841_v26 = vpack.c.bf16 %v2805_v24, %v2805_v24  ;;  %v3904_v27 = vpop.f32.mrb[27].mxu1 }
 0x64a   : > { %v2889_v50 = vrot.slane %v2872_v23, 2 }
 0x64b   : > { %v2888_v28 = vsel %vm2887_vm7, %v2886_v25, %v2885_v22  ;;  %v2873_v54 = vunpack.c.l.b16 %v2841_v26 }
 0x64c   : > { %v2891_v29 = vsel %vm2890_vm8, %v2889_v50, %v2888_v28 }
 0x64d   : > { %v2892_v57 = vrot.slane %v2873_v54, 1 }
 0x64f   : > { %v2894_v30 = vsel %vm2893_vm9, %v2892_v57, %v2891_v29 }
 0x650   : > { %v2895_v31 = vpack.c.b16 %v2894_v30, %v2894_v30 }
 0x652   : > { %3922 = vmatmul.mubr.bf16.vlgmr.msra.gmra.mrb[28].mxu0 %v2895_v31 }
 0x668   : > { %v3067_v59 = vpop.f32.mrb[28].mxu1 }
 0x669   : > { %v3943_v32 = vpop.f32.mrb[29].mxu1 }
 0x66a   : > { %v3070_v62 = vpop.f32.mrb[30].mxu1 }
 0x66b   : > { %v3944_v33 = vpop.f32.mrb[31].mxu1 }
 0x725   : > { %v2979_v0 = vpop.f32.mrb[28].mxu0 }
 0x726   : > { %v3068_v35 = vadd.f32 %v3067_v59, %v2979_v0  ;;  %v3923_v36 = vpop.f32.mrb[29].mxu0 }
 0x727   : > { %v2982_v37 = vpop.f32.mrb[30].mxu0 }
 0x728   : > { %v3080_v38 = vadd.f32 %v3574_v34, %v3068_v35  ;;  %v3924_v39 = vpop.f32.mrb[31].mxu0 }
 0x72a   : > { %4280 = vtanh.f32 %v3080_v38 }
 0x734   : > { %v4281_v40 = vpop.eup %4280 }
 0x735   : > { %v3082_v41 = vpack.c.bf16 %v4281_v40, %v4281_v40 }
 0x737   : > { %3083 = vst [vmem:[#allocation2] sm:$0xf] %v3082_v41 }
 0x738 PF: > { %v4282_v42 = vld [vmem:[%s5470_s14] sm:$0xff]   ;;  %v4898_v43 = vmov 0.0   ;;  %v4283_v44 = vld [vmem:[%s5470_s14 + $0x8] sm:$0xff]   ;;  %vm4899_vm10 = vmmov 0   ;;  %v4284_v46 = vld [vmem:[%s5470_s14 + $0x10] sm:$0xff]   ;;  %s3584_s11 = sshll.u32 %s5025_s2, 3 }
 0x739   : > { %3945 = vmatprep.subr.bf16.mxu0 %v4898_v43  ;;  %3961 = vmatprep.mubr.msk.bf16.mxu0 %vm4899_vm10, %v4898_v43  ;;  %v4285_v45 = vld [vmem:[%s5470_s14 + $0x18] sm:$0xff]   ;;  %v4286_v47 = vld [vmem:[%s5470_s14 + $0x20] sm:$0xff]   ;;  %v4287_v48 = vld [vmem:[%s5470_s14 + $0x28] sm:$0xff]   ;;  %s3197_s0 = scalar_lea.vmem [#allocation28], %s3584_s11  ;;  %p3585_p9 = scmp.ne.s32.totalorder %s5025_s2, 1 }
 0x73a   : > { %3946 = vmatpush3.bf16.msra.mxu0 %v4282_v42  ;;  %v4288_v49 = vld [vmem:[%s5470_s14 + $0x30] sm:$0xff]   ;;  %v4289_v51 = vld [vmem:[%s5470_s14 + $0x38] sm:$0xff]   ;;  %v3575_v55 = vld [vmem:[%s5476_s25] ss:$0 sm:$0xff] }
 0x73b   : > { %3947 = vmatprep.subr.bf16.mxu0 %v4898_v43 }
 0x73e   : > { %3948 = vmatpush3.bf16.msra.mxu0 %v4283_v44  ;;  %v3084_v16 = vld [vmem:[#allocation2] sm:$0xf] }
 0x73f   : > { %3949 = vmatprep.subr.bf16.mxu0 %v4898_v43 }
 0x742   : > { %3950 = vmatpush3.bf16.msra.mxu0 %v4284_v46 }
 0x743   : > { %3951 = vmatprep.subr.bf16.mxu0 %v4898_v43 }
 0x746   : > { %3952 = vmatpush3.bf16.msra.mxu0 %v4285_v45 }
 0x747   : > { %3953 = vmatprep.subr.bf16.mxu0 %v4898_v43 }
 0x74a   : > { %3954 = vmatpush3.bf16.msra.mxu0 %v4286_v47 }
 0x74b   : > { %3955 = vmatprep.subr.bf16.mxu0 %v4898_v43 }
 0x74e   : > { %3956 = vmatpush3.bf16.msra.mxu0 %v4287_v48 }
 0x74f   : > { %3957 = vmatprep.subr.bf16.mxu0 %v4898_v43 }
 0x752   : > { %3958 = vmatpush3.bf16.msra.mxu0 %v4288_v49 }
 0x753   : > { %3959 = vmatprep.subr.bf16.mxu0 %v4898_v43 }
 0x756   : > { %3960 = vmatpush3.bf16.msra.mxu0 %v4289_v51 }
 0x759   : > { %3962 = vmatmul.mubr.bf16.vlgmr.msra.gmra.mrb[0].mxu0 %v3084_v16 }
 0x829   : > { %3202 = sbr.rel (%p3585_p9) target bundleno = 2428 (0x97c), region = 164 }
 0x82c   : > { %v3190_v56 = vpop.f32.mrb[0].mxu0 }
 0x82d   : > { %v3191_v58 = vadd.f32 %v3575_v55, %v3190_v56  ;;  %v3963_v60 = vpop.f32.mrb[1].mxu0 }
 0x82e   : > { %v3193_v61 = vpop.f32.mrb[2].mxu0 }
 0x82f   : > { %3198 = vst [vmem:[%s3197_s0] sm:$0xff] %v3191_v58  ;;  %v3964_v63 = vpop.f32.mrb[3].mxu0 }
 0x836   : > { %v3203_v2 = vld [vmem:[#allocation28] sm:$0xff]  ;;  %v3204_v3 = vld [vmem:[#allocation28 + $0x8] sm:$0xff] }
 0x837   : > { %3205 = vmax.xlane.f32.xlu0 %v3203_v2 }
 0x83b   : > { %3207 = vmax.xlane.f32.xlu0 %v3204_v3 }
 0x8c4   : > { %v3206_v4 = vpop.xlane.xlu0 %3205 }
 0x8c8   : > { %v3208_v1 = vpop.xlane.xlu0 %3207 }
 0x8c9   : > { %v3209_v5 = vmax.f32 %v3206_v4, %v3208_v1 }
 0x8cb   : > { %v3210_v6 = vsub.f32 %v3203_v2, %v3209_v5  ;;  %v3211_v7 = vsub.f32 %v3204_v3, %v3209_v5 }
 0x8cd   : > { %v3212_v52 = vmul.f32 1.442695, %v3210_v6  ;;  %v3214_v8 = vmul.f32 1.442695, %v3211_v7 }
 0x8cf   : > { %4290 = vpow2.f32 %v3212_v52 }
 0x8d0   : > { %4292 = vpow2.f32 %v3214_v8 }
 0x8d9   : > { %v4291_v9 = vpop.eup %4290 }
 0x8da   : > { %3216 = vadd.xlane.f32.xlu1 %v4291_v9  ;;  %v4293_v10 = vpop.eup %4292 }
 0x8de   : > { %3218 = vadd.xlane.f32.xlu1 %v4293_v10 }
 0x967   : > { %v3217_v11 = vpop.xlane.xlu1 %3216 }
 0x96b   : > { %v3219_v53 = vpop.xlane.xlu1 %3218 }
 0x96c   : > { %v3220_v12 = vadd.f32 %v3219_v53, %v3217_v11 }
 0x96e   : > { %4294 = vrcp.f32 %v3220_v12 }
 0x978   : > { %v4295_v13 = vpop.eup %4294 }
 0x979   : > { %v3222_v14 = vmul.f32 %v4295_v13, %v4291_v9  ;;  %v3223_v15 = vmul.f32 %v4295_v13, %v4293_v10 }
 0x97b   : > { %3224 = vst [vmem:[#allocation28] sm:$0xff] %v3222_v14  ;;  %3225 = vst [vmem:[#allocation28 + $0x8] sm:$0xff] %v3223_v15 }
 0x97c PF: > { %p4112_p13 = scmp.eq.s32.totalorder %s5025_s2, 1  ;;  %s4900_s14 = smov [#allocation28]  }
 0x97d   : > { %s3232_s25 = sshll.u32 %s4900_s14, 4  ;;  %s3233_s25 = int_to_ptr.vmem [resolvable:$true] %s3232_s25 }
 0x97e   : > { %s4748_s19 = scalar_lea.vmem %s3233_s25, 256  ;;  %p4755_p11 = scmp.lt.s32.totalorder %s3233_s25, %s3233_s25 }
 0x97f   : > { %p4749_p3 = scmp.ne.s32.totalorder %s3233_s25, %s4748_s19  ;;  %p4756_p2 = scmp.lt.s32.totalorder %s4748_s19, %s4748_s19 }
 0x981   : > { %p4750_p1 = pnand %p4749_p3, %p4112_p13  ;;  %p4757_p4 = por %p4756_p2, %p4755_p11 }
 0x983   : > { %p4751_p8 = pneg %p4750_p1 }
 0x985   : > { %p4758_p6 = pnand %p4757_p4, %p4751_p8 }
 0x987   : > { %4761 = shalt.err (!%p4758_p6)
}
 0x988   : > { %s5888_s10 = sld [smem:[#allocation58_spill]] }
 0x98e   : > { %s4762_s1 = scalar_lea.hbm %s5888_s10, 256 }
 0x98f   : > { %p4763_p7 = scmp.ne.s32.totalorder %s5888_s10, %s4762_s1  ;;  %p4768_p0 = scmp.lt.u32.totalorder %s4762_s1, %s5888_s10 }
 0x991   : > { %p4764_p10 = pnand %p4763_p7, %p4112_p13 }
 0x993   : > { %p4765_p12 = pneg %p4764_p10 }
 0x995   : > { %p4770_p5 = pnand %p4768_p0, %p4765_p12 }
 0x997   : > { %4773 = shalt.err (!%p4770_p5)
}
 0x998   : > { %s4901_s24 = smov 128   ;;  %s4902_s22 = smov 8  }
 0x999   : > { %4026 = dma.vmem_to_hbm [thread:$0]  (%p4112_p13), %s3233_s25, 256, %s5888_s10, [#allocation5], %s4901_s24, %s4901_s24, %s4902_s22  }
 0x99a   : > { %s4903_s17 = smov [#allocation29]  }
 0x99b   : > { %s3246_s11 = sshll.u32 %s4903_s17, 4  ;;  %s3247_s11 = int_to_ptr.vmem [resolvable:$true] %s3246_s11 }
 0x99c   : > { %s4774_s0 = scalar_lea.vmem %s3247_s11, 128  ;;  %p4781_p8 = scmp.lt.s32.totalorder %s3247_s11, %s3247_s11 }
 0x99d   : > { %p4775_p9 = scmp.ne.s32.totalorder %s3247_s11, %s4774_s0  ;;  %p4782_p11 = scmp.lt.s32.totalorder %s4774_s0, %s4774_s0 }
 0x99f   : > { %p4776_p3 = pnand %p4775_p9, %p4112_p13  ;;  %p4783_p2 = por %p4782_p11, %p4781_p8 }
 0x9a1   : > { %p4777_p1 = pneg %p4776_p3 }
 0x9a3   : > { %p4784_p4 = pnand %p4783_p2, %p4777_p1 }
 0x9a5   : > { %4787 = shalt.err (!%p4784_p4)
}
 0x9a6   : > { %s5889_s12 = sld [smem:[#allocation59_spill]] }
 0x9ac   : > { %s4788_s21 = scalar_lea.hbm %s5889_s12, 128 }
 0x9ad   : > { %p4789_p6 = scmp.ne.s32.totalorder %s5889_s12, %s4788_s21  ;;  %p4794_p12 = scmp.lt.u32.totalorder %s4788_s21, %s5889_s12 }
 0x9af   : > { %p4790_p7 = pnand %p4789_p6, %p4112_p13 }
 0x9b1   : > { %p4791_p10 = pneg %p4790_p7 }
 0x9b3   : > { %p4796_p0 = pnand %p4794_p12, %p4791_p10 }
 0x9b5   : > { %4799 = shalt.err (!%p4796_p0)
}
 0x9b6   : > { %4028 = dma.vmem_to_hbm [thread:$0]  (%p4112_p13), %s3247_s11, 128, %s5889_s12, [#allocation30]  }
 0x9b7   : > { %4853 = dma.done.wait (%p4112_p13), [#allocation5], 256  }
 0x9b8   : > { %4855 = vsyncadd (%p4112_p13), [#allocation5], 4294967040 }
 0x9b9   : > { %4857 = dma.done.wait (%p4112_p13), [#allocation30], 128  }
 0x9ba   : > { %4859 = vsyncadd (%p4112_p13), [#allocation30], 4294967168 }
 0x9bb PF: > { %p37_p5 = scmp.ge.s32.totalorder %s5202_s29, 4   ;;  %s5890_s0 = smov %s4866_s30 }
 0x9bc   : > { %s5891_s30 = smov %s4870_s20  ;;  %s5892_s20 = smov %s5213_s28 }
 0x9bd   : > { %s5893_s21 = smov %s5202_s29  ;;  %39 = sbr.rel (!%p37_p5) target bundleno = 29 (0x1d), region = 212 }
 0x9c4   :  { %3263 = vsyncpa [#allocation4], 1 }
 0x9c5   :  { %3265 = vsyncpa [#allocation4 + $0x1], 1 }
 0x9c6   :  { %3266 = vsyncpa [#allocation7], 1 }
 0x9c7   :  { %3267 = vsyncpa [#allocation10], 1 }
 0x9c8   :  { %3268 = vsyncpa [#allocation13], 1 }
 0x9c9   :  { %3269 = vsyncpa [#allocation16], 1 }
 0x9ca   :  { %3270 = vsyncpa [#allocation19], 1 }
 0x9cb   :  { %3271 = vsyncpa [#allocation22], 1 }
 0x9cc   :  { %3272 = vsyncpa [#allocation25], 1 }
 0x9cd   :  { %3273 = vsyncpa [#allocation5], 1 }
 0x9ce   :  { %3275 = vsyncpa [#allocation5 + $0x1], 1 }
 0x9cf   :  { %3276 = vsyncpa [#allocation30], 1 }

</bundles_post_ra>
